<compile_context>
chip_gen: v6e
topology: v6e:2x2x1
jax: 0.10.0
libtpu: 0.0.40
codegen_flags: <defaults>
</compile_context>

<pallas_src>
import functools
import math

import jax
import jax.numpy as jnp
from jax.experimental import pallas as pl
from jax.experimental.pallas import tpu as pltpu


def _round_up(x: int, m: int) -> int:
    return ((x + m - 1) // m) * m


def _lcm(a: int, b: int) -> int:
    return a * b // math.gcd(a, b)


def _vmem_capacity_bytes() -> int:
    try:
        info = pltpu.get_tpu_info()
        cap = getattr(info, "vmem_capacity_bytes", None)
        if cap:
            return int(cap)
    except Exception:
        pass
    return 64 * 1024 * 1024  # conservative fallback (v7x-sized)


def _fastap_kernel(x_row_ref, xt_col_ref, y_col_ref, y_row_ref, part_ref,
                   hpos_ref, hall_ref, npos_ref, *, num_bins: int, n: int):
    i = pl.program_id(0)            # row-block index ("parallel")
    j = pl.program_id(1)            # column-block index ("arbitrary", reduction)
    TM = x_row_ref.shape[0]
    TN = xt_col_ref.shape[1]
    L = num_bins + 1

    # Reset per-row-tile accumulators at the first column step.
    @pl.when(j == 0)
    def _():
        hpos_ref[...] = jnp.zeros_like(hpos_ref)
        hall_ref[...] = jnp.zeros_like(hall_ref)
        npos_ref[...] = jnp.zeros_like(npos_ref)

    # Gram tile on the MXU; rhs was transposed once in the wrapper so this is a
    # clean (M,K)x(K,N) contraction (no in-kernel relayout).
    gram = jax.lax.dot_general(
        x_row_ref[...], xt_col_ref[...], (((1,), (0,)), ((), ())),
        preferred_element_type=jnp.float32)
    dist2 = 2.0 - 2.0 * gram        # (TM, TN); assumes L2-normalized embeddings

    # Thin global row/col id vectors; masks fused via broadcasting.
    row_id = i * TM + jax.lax.broadcasted_iota(jnp.int32, (TM, 1), 0)   # (TM, 1)
    col_id = j * TN + jax.lax.broadcasted_iota(jnp.int32, (1, TN), 1)   # (1, TN)
    off_diag_valid = (row_id != col_id) & (col_id < n)                  # (TM, TN)
    same = (y_col_ref[...] == y_row_ref[...])                           # (TM, TN)

    pos_f = jnp.where(same & off_diag_valid, 1.0, 0.0).astype(jnp.float32)
    npos_ref[...] += jnp.sum(pos_f, axis=1, keepdims=True)              # (TM, 1)

    # Pre-scaled distances; diagonal / padded columns pushed out of the pulse
    # support so h_all = sum(pulse) needs no extra mask multiply per bin.
    inv_delta = jnp.float32(num_bins / 4.0)
    q = jnp.where(off_diag_valid, dist2 * inv_delta, jnp.float32(1e9))  # (TM, TN)

    lane_id = jax.lax.broadcasted_iota(jnp.int32, (1, 128), 1)

    def bin_body(idx, carry):
        pulse = jnp.maximum(0.0, 1.0 - jnp.abs(q - idx.astype(jnp.float32)))
        hp = jnp.sum(pulse * pos_f, axis=1, keepdims=True)              # (TM, 1)
        ha = jnp.sum(pulse, axis=1, keepdims=True)                      # (TM, 1)
        hit = lane_id == idx                                            # (1, 128)
        hpos_ref[...] += jnp.where(hit, hp, 0.0)
        hall_ref[...] += jnp.where(hit, ha, 0.0)
        return carry

    # Bounded live range (one pulse tile at a time), unrolled for scheduling.
    jax.lax.fori_loop(0, L, bin_body, 0, unroll=True)

    # Finalize once per row block: tiny (TM, 1) cumsum/AP math + partial output.
    @pl.when(j == pl.num_programs(1) - 1)
    def _():
        hpos = hpos_ref[...]
        hall = hall_ref[...]
        npos = npos_ref[...]
        cum_pos = jnp.zeros((TM, 1), jnp.float32)
        cum_all = jnp.zeros((TM, 1), jnp.float32)
        ap = jnp.zeros((TM, 1), jnp.float32)
        for idx in range(L):                      # static, (TM, 1) ops only
            hp = hpos[:, idx:idx + 1]
            ha = hall[:, idx:idx + 1]
            cum_pos = cum_pos + hp
            cum_all = cum_all + ha
            ap = ap + jnp.where(cum_all > 0.0, hp * cum_pos / cum_all, 0.0)

        is_valid = (npos > 0.0) & (row_id < n)                          # (TM, 1)
        per_sample = jnp.where(is_valid, ap / jnp.maximum(npos, 1.0), 0.0)
        blk_ap = jnp.sum(per_sample)
        blk_cnt = jnp.sum(is_valid.astype(jnp.float32))

        # Lane-dense (1, 128) row: lane 0 = AP partial sum, lane 1 = valid count.
        part = (jnp.where(lane_id == 0, blk_ap, 0.0)
                + jnp.where(lane_id == 1, blk_cnt, 0.0))
        part_ref[...] = part.astype(part_ref.dtype)


def fast_ap_loss(embeddings: jax.Array, labels: jax.Array, num_bins: int = 10,
                 row_tile: int = 256, col_tile: int = 512) -> jax.Array:
    """Pallas TPU implementation of OfficialFastAPLoss.forward.

    Assumes L2-normalized embeddings (dist2 = 2 - 2<xi,xj> in [0, 4]), matching
    the PyTorch reference usage.  Embeddings keep their input dtype: pass bf16
    to halve HBM/VMEM traffic on v6e/v7x.
    """
    N, D = embeddings.shape
    assert num_bins + 1 <= 128, "num_bins+1 must fit in one lane row"

    N_pad0 = _round_up(max(N, 1), 128)
    TN = min(col_tile, N_pad0)
    TM = min(row_tile, N_pad0)
    N_pad = _round_up(N, _lcm(TM, TN))
    nrows = N_pad // TM
    ncols = N_pad // TN

    x = embeddings                                  # keep dtype (f32 or bf16)
    lab = labels.reshape(-1).astype(jnp.int32)
    if N_pad != N:
        x = jnp.pad(x, ((0, N_pad - N), (0, 0)))
        lab = jnp.pad(lab, (0, N_pad - N), constant_values=-1)
    x_t = x.T                                       # (D, N_pad): one-time XLA transpose
    y_col = lab.reshape(N_pad, 1)
    y_row = lab.reshape(1, N_pad)

    esize = x.dtype.itemsize
    L = num_bins + 1
    flops = 2 * N_pad * N_pad * D + 8 * L * N_pad * N_pad
    bytes_accessed = (N_pad * D * esize             # row tiles: once each
                      + nrows * N_pad * D * esize   # column tiles: once per row block
                      + (nrows + 1) * N_pad * 4     # labels (col view once, row view per i)
                      + nrows * 128 * 4)            # partial outputs

    # VMEM working set: double-buffered streamed tiles + histogram scratch +
    # a handful of live (TM, TN) f32 temporaries.
    vmem_need = (2 * TM * D * esize + 2 * D * TN * esize
                 + 2 * (TM * 4 + TN * 4 + 128 * 4)
                 + 3 * TM * 128 * 4
                 + 8 * TM * TN * 4
                 + (2 << 20))
    cap = _vmem_capacity_bytes()
    vmem_limit = int(min(max(vmem_need, 32 * 1024 * 1024), cap - 16 * 1024 * 1024))
    vmem_limit = max(vmem_limit, 16 * 1024 * 1024)

    parts = pl.pallas_call(
        functools.partial(_fastap_kernel, num_bins=num_bins, n=N),
        out_shape=jax.ShapeDtypeStruct((nrows, 128), jnp.float32),
        grid=(nrows, ncols),
        in_specs=[
            pl.BlockSpec((TM, D), lambda i, j: (i, 0)),   # row tile of x (resident over j)
            pl.BlockSpec((D, TN), lambda i, j: (0, j)),   # streamed column tile of x^T
            pl.BlockSpec((TM, 1), lambda i, j: (i, 0)),   # labels, column view
            pl.BlockSpec((1, TN), lambda i, j: (0, j)),   # labels, row view
        ],
        out_specs=pl.BlockSpec((1, 128), lambda i, j: (i, 0)),
        scratch_shapes=[
            pltpu.VMEM((TM, 128), jnp.float32),   # h_pos histogram (bins in lanes)
            pltpu.VMEM((TM, 128), jnp.float32),   # h_all histogram
            pltpu.VMEM((TM, 1), jnp.float32),     # N_pos
        ],
        compiler_params=pltpu.CompilerParams(
            dimension_semantics=("parallel", "arbitrary"),
            vmem_limit_bytes=vmem_limit),
        cost_estimate=pl.CostEstimate(
            flops=int(flops), transcendentals=0, bytes_accessed=int(bytes_accessed)),
    )(x, x_t, y_col, y_row)

    ap_total = jnp.sum(parts[:, 0])
    n_valid = jnp.sum(parts[:, 1])
    # NaN iff no sample has a positive pair (matches the PyTorch reference).
    return 1.0 - ap_total / n_valid


def _reference_jax(embeddings, labels, num_bins):
    # Pure-JAX reference mirroring the PyTorch forward, for a correctness check.
    N = embeddings.shape[0]
    Y = labels.reshape(N, 1)
    aff = 2.0 * (Y == Y.T).astype(embeddings.dtype) - 1.0
    aff = aff * (1.0 - jnp.eye(N, dtype=embeddings.dtype))
    I_pos = (aff > 0).astype(embeddings.dtype)
    I_neg = (aff < 0).astype(embeddings.dtype)
    N_pos = jnp.sum(I_pos, 1)
    dist2 = 2.0 - 2.0 * embeddings @ embeddings.T
    delta = 4.0 / num_bins
    Z = jnp.linspace(0.0, 4.0, num_bins + 1)
    pulse = jnp.maximum(0.0, 1.0 - jnp.abs(dist2[:, :, None] - Z[None, None, :]) / delta)
    h_pos = jnp.sum(pulse * I_pos[:, :, None], 1)
    h_neg = jnp.sum(pulse * I_neg[:, :, None], 1)
    H_pos = jnp.cumsum(h_pos, 1)
    H = jnp.cumsum(h_pos + h_neg, 1)
    fast_ap = h_pos * H_pos / H
    fast_ap = jnp.where(jnp.isfinite(fast_ap), fast_ap, 0.0)
    fast_ap = jnp.sum(fast_ap, 1) / N_pos
    valid = ~jnp.isnan(fast_ap)
    return 1.0 - jnp.sum(jnp.where(valid, fast_ap, 0.0)) / jnp.sum(valid)


if __name__ == "__main__":
    key = jax.random.PRNGKey(0)
    N, D, NUM_BINS = 8, 32, 10

    emb = jax.random.normal(key, (N, D), dtype=jnp.float32)
    # L2-normalize so dist2 = 2 - 2<x_i,x_j> is the true squared distance in [0, 4].
    emb = emb / jnp.linalg.norm(emb, axis=1, keepdims=True)
    labels = jnp.array([0, 0, 1, 1, 2, 2, 3, 3], dtype=jnp.int32)

    loss = fast_ap_loss(emb, labels, num_bins=NUM_BINS)
    jax.block_until_ready(loss)

    ref = _reference_jax(emb, labels, NUM_BINS)
    assert jnp.allclose(loss, ref, atol=1e-5, rtol=1e-5), (loss, ref)
    print("KERNEL_OK")
</pallas_src>

<mosaic_0001>
module attributes {stable_mosaic.version = 11 : i64} {
  func.func @_fastap_kernel(%arg0: i32, %arg1: i32, %arg2: memref<128x32xf32, #tpu.memory_space<vmem>>, %arg3: memref<32x128xf32, #tpu.memory_space<vmem>>, %arg4: memref<128x1xi32, #tpu.memory_space<vmem>>, %arg5: memref<1x128xi32, #tpu.memory_space<vmem>>, %arg6: memref<1x128xf32, #tpu.memory_space<vmem>>, %arg7: memref<128x128xf32, #tpu.memory_space<vmem>>, %arg8: memref<128x128xf32, #tpu.memory_space<vmem>>, %arg9: memref<128x1xf32, #tpu.memory_space<vmem>>) attributes {dimension_semantics = [#tpu.dimension_semantics<parallel>, #tpu.dimension_semantics<arbitrary>], iteration_bounds = array<i64: 1, 1>, scalar_prefetch = 0 : i64, scratch_operands = 3 : i64, tpu.core_type = #tpu.core_type<tc>, window_params = [{transform_indices = @transform_0, window_bounds = array<i64: 128, 32>}, {transform_indices = @transform_1, window_bounds = array<i64: 32, 128>}, {transform_indices = @transform_2, window_bounds = array<i64: 128, 1>}, {transform_indices = @transform_3, window_bounds = array<i64: 1, 128>}, {transform_indices = @transform_4, window_bounds = array<i64: 1, 128>}]} {
    %c0_i32 = arith.constant 0 : i32
    %0 = arith.cmpi eq, %arg1, %c0_i32 : i32
    %1 = arith.extui %0 : i1 to i32
    %c0_i32_0 = arith.constant 0 : i32
    %2 = arith.cmpi ne, %1, %c0_i32_0 : i32
    scf.if %2 {
      %cst_178 = arith.constant 0.000000e+00 : f32
      %410 = vector.broadcast %cst_178 : f32 to vector<128x128xf32>
      %c0_179 = arith.constant 0 : index
      %c0_180 = arith.constant 0 : index
      %411 = vector.load %arg7[%c0_179, %c0_180] : memref<128x128xf32, #tpu.memory_space<vmem>>, vector<128x128xf32>
      tpu.vector_store %arg7[%c0_179, %c0_180], %410 {strides = array<i32>} : memref<128x128xf32, #tpu.memory_space<vmem>>, vector<128x128xf32>,
      %cst_181 = arith.constant 0.000000e+00 : f32
      %412 = vector.broadcast %cst_181 : f32 to vector<128x128xf32>
      %c0_182 = arith.constant 0 : index
      %c0_183 = arith.constant 0 : index
      %413 = vector.load %arg8[%c0_182, %c0_183] : memref<128x128xf32, #tpu.memory_space<vmem>>, vector<128x128xf32>
      tpu.vector_store %arg8[%c0_182, %c0_183], %412 {strides = array<i32>} : memref<128x128xf32, #tpu.memory_space<vmem>>, vector<128x128xf32>,
      %cst_184 = arith.constant 0.000000e+00 : f32
      %414 = vector.broadcast %cst_184 : f32 to vector<128x1xf32>
      %c0_185 = arith.constant 0 : index
      %c0_186 = arith.constant 0 : index
      %415 = vector.load %arg9[%c0_185, %c0_186] : memref<128x1xf32, #tpu.memory_space<vmem>>, vector<128x1xf32>
      tpu.vector_store %arg9[%c0_185, %c0_186], %414 {strides = array<i32>} : memref<128x1xf32, #tpu.memory_space<vmem>>, vector<128x1xf32>,
    } else {
    }
    %c0 = arith.constant 0 : index
    %c0_1 = arith.constant 0 : index
    %3 = vector.load %arg2[%c0, %c0_1] : memref<128x32xf32, #tpu.memory_space<vmem>>, vector<128x32xf32>
    %c0_2 = arith.constant 0 : index
    %c0_3 = arith.constant 0 : index
    %4 = vector.load %arg3[%c0_2, %c0_3] : memref<32x128xf32, #tpu.memory_space<vmem>>, vector<32x128xf32>
    %cst = arith.constant dense<0.000000e+00> : vector<128x128xf32>
    %5 = tpu.matmul %3, %4, %cst {dimension_numbers = #tpu.dot_dimension_numbers<[1], [0], [0], [1], [0, 0, 1, 1], [], []>} : vector<128x32xf32>, vector<32x128xf32>, vector<128x128xf32> -> vector<128x128xf32>
    %cst_4 = arith.constant 2.000000e+00 : f32
    %6 = vector.broadcast %cst_4 : f32 to vector<128x128xf32>
    %7 = arith.mulf %6, %5 : vector<128x128xf32>
    %cst_5 = arith.constant 2.000000e+00 : f32
    %8 = vector.broadcast %cst_5 : f32 to vector<128x128xf32>
    %9 = arith.subf %8, %7 : vector<128x128xf32>
    %c128_i32 = arith.constant 128 : i32
    %10 = arith.muli %arg0, %c128_i32 : i32
    %11 = tpu.iota {dimensions = array<i32: 0>} : vector<128x1xi32>
    %12 = vector.broadcast %10 : i32 to vector<128x1xi32>
    %13 = arith.addi %12, %11 : vector<128x1xi32>
    %c128_i32_6 = arith.constant 128 : i32
    %14 = arith.muli %arg1, %c128_i32_6 : i32
    %15 = tpu.iota {dimensions = array<i32: 1>} : vector<1x128xi32>
    %16 = vector.broadcast %14 : i32 to vector<1x128xi32>
    %17 = arith.addi %16, %15 : vector<1x128xi32>
    %18 = vector.broadcast %13 : vector<128x1xi32> to vector<128x128xi32>
    %19 = vector.broadcast %17 : vector<1x128xi32> to vector<128x128xi32>
    %20 = arith.cmpi ne, %18, %19 : vector<128x128xi32>
    %c8_i32 = arith.constant 8 : i32
    %21 = vector.broadcast %c8_i32 : i32 to vector<1x128xi32>
    %22 = arith.cmpi slt, %17, %21 : vector<1x128xi32>
    %23 = vector.broadcast %22 : vector<1x128xi1> to vector<128x128xi1>
    %24 = arith.andi %20, %23 : vector<128x128xi1>
    %c0_7 = arith.constant 0 : index
    %c0_8 = arith.constant 0 : index
    %25 = vector.load %arg4[%c0_7, %c0_8] : memref<128x1xi32, #tpu.memory_space<vmem>>, vector<128x1xi32>
    %c0_9 = arith.constant 0 : index
    %c0_10 = arith.constant 0 : index
    %26 = vector.load %arg5[%c0_9, %c0_10] : memref<1x128xi32, #tpu.memory_space<vmem>>, vector<1x128xi32>
    %27 = vector.broadcast %25 : vector<128x1xi32> to vector<128x128xi32>
    %28 = vector.broadcast %26 : vector<1x128xi32> to vector<128x128xi32>
    %29 = arith.cmpi eq, %27, %28 : vector<128x128xi32>
    %30 = arith.andi %29, %24 : vector<128x128xi1>
    %cst_11 = arith.constant 1.000000e+00 : f32
    %cst_12 = arith.constant 0.000000e+00 : f32
    %31 = vector.broadcast %cst_11 : f32 to vector<128x128xf32>
    %32 = vector.broadcast %cst_12 : f32 to vector<128x128xf32>
    %33 = arith.select %30, %31, %32 : vector<128x128xi1>, vector<128x128xf32>
    %c0_13 = arith.constant 0 : index
    %c0_14 = arith.constant 0 : index
    %34 = vector.load %arg9[%c0_13, %c0_14] : memref<128x1xf32, #tpu.memory_space<vmem>>, vector<128x1xf32>
    %cst_15 = arith.constant dense<0.000000e+00> : vector<128xf32>
    %35 = vector.multi_reduction <add>, %33, %cst_15 [1] : vector<128x128xf32> to vector<128xf32>
    %36 = vector.shape_cast %35 : vector<128xf32> to vector<128x1xf32>
    %37 = arith.addf %34, %36 : vector<128x1xf32>
    %c0_16 = arith.constant 0 : index
    %c0_17 = arith.constant 0 : index
    %38 = vector.load %arg9[%c0_16, %c0_17] : memref<128x1xf32, #tpu.memory_space<vmem>>, vector<128x1xf32>
    tpu.vector_store %arg9[%c0_16, %c0_17], %37 {strides = array<i32>} : memref<128x1xf32, #tpu.memory_space<vmem>>, vector<128x1xf32>,
    %cst_18 = arith.constant 2.500000e+00 : f32
    %39 = vector.broadcast %cst_18 : f32 to vector<128x128xf32>
    %40 = arith.mulf %9, %39 : vector<128x128xf32>
    %cst_19 = arith.constant 1.000000e+09 : f32
    %41 = vector.broadcast %cst_19 : f32 to vector<128x128xf32>
    %42 = arith.select %24, %40, %41 : vector<128x128xi1>, vector<128x128xf32>
    %43 = tpu.iota {dimensions = array<i32: 1>} : vector<1x128xi32>
    %c0_i32_20 = arith.constant 0 : i32
    %44 = arith.sitofp %c0_i32_20 : i32 to f32
    %45 = vector.broadcast %44 : f32 to vector<128x128xf32>
    %46 = arith.subf %42, %45 : vector<128x128xf32>
    %47 = math.absf %46 : vector<128x128xf32>
    %cst_21 = arith.constant 1.000000e+00 : f32
    %48 = vector.broadcast %cst_21 : f32 to vector<128x128xf32>
    %49 = arith.subf %48, %47 : vector<128x128xf32>
    %cst_22 = arith.constant 0.000000e+00 : f32
    %50 = vector.broadcast %cst_22 : f32 to vector<128x128xf32>
    %51 = arith.maximumf %50, %49 : vector<128x128xf32>
    %52 = arith.mulf %51, %33 : vector<128x128xf32>
    %cst_23 = arith.constant dense<0.000000e+00> : vector<128xf32>
    %53 = vector.multi_reduction <add>, %52, %cst_23 [1] : vector<128x128xf32> to vector<128xf32>
    %54 = vector.shape_cast %53 : vector<128xf32> to vector<128x1xf32>
    %cst_24 = arith.constant dense<0.000000e+00> : vector<128xf32>
    %55 = vector.multi_reduction <add>, %51, %cst_24 [1] : vector<128x128xf32> to vector<128xf32>
    %56 = vector.shape_cast %55 : vector<128xf32> to vector<128x1xf32>
    %57 = vector.broadcast %c0_i32_20 : i32 to vector<1x128xi32>
    %58 = arith.cmpi eq, %43, %57 : vector<1x128xi32>
    %c0_25 = arith.constant 0 : index
    %c0_26 = arith.constant 0 : index
    %59 = vector.load %arg7[%c0_25, %c0_26] : memref<128x128xf32, #tpu.memory_space<vmem>>, vector<128x128xf32>
    %cst_27 = arith.constant 0.000000e+00 : f32
    %60 = vector.shape_cast %58 : vector<1x128xi1> to vector<1x128xi1>
    %61 = vector.broadcast %60 : vector<1x128xi1> to vector<128x128xi1>
    %62 = vector.shape_cast %54 : vector<128x1xf32> to vector<128x1xf32>
    %63 = vector.broadcast %62 : vector<128x1xf32> to vector<128x128xf32>
    %64 = vector.broadcast %cst_27 : f32 to vector<128x128xf32>
    %65 = arith.select %61, %63, %64 : vector<128x128xi1>, vector<128x128xf32>
    %66 = arith.addf %59, %65 : vector<128x128xf32>
    %c0_28 = arith.constant 0 : index
    %c0_29 = arith.constant 0 : index
    %67 = vector.load %arg7[%c0_28, %c0_29] : memref<128x128xf32, #tpu.memory_space<vmem>>, vector<128x128xf32>
    tpu.vector_store %arg7[%c0_28, %c0_29], %66 {strides = array<i32>} : memref<128x128xf32, #tpu.memory_space<vmem>>, vector<128x128xf32>,
    %c0_30 = arith.constant 0 : index
    %c0_31 = arith.constant 0 : index
    %68 = vector.load %arg8[%c0_30, %c0_31] : memref<128x128xf32, #tpu.memory_space<vmem>>, vector<128x128xf32>
    %cst_32 = arith.constant 0.000000e+00 : f32
    %69 = vector.shape_cast %58 : vector<1x128xi1> to vector<1x128xi1>
    %70 = vector.broadcast %69 : vector<1x128xi1> to vector<128x128xi1>
    %71 = vector.shape_cast %56 : vector<128x1xf32> to vector<128x1xf32>
    %72 = vector.broadcast %71 : vector<128x1xf32> to vector<128x128xf32>
    %73 = vector.broadcast %cst_32 : f32 to vector<128x128xf32>
    %74 = arith.select %70, %72, %73 : vector<128x128xi1>, vector<128x128xf32>
    %75 = arith.addf %68, %74 : vector<128x128xf32>
    %c0_33 = arith.constant 0 : index
    %c0_34 = arith.constant 0 : index
    %76 = vector.load %arg8[%c0_33, %c0_34] : memref<128x128xf32, #tpu.memory_space<vmem>>, vector<128x128xf32>
    tpu.vector_store %arg8[%c0_33, %c0_34], %75 {strides = array<i32>} : memref<128x128xf32, #tpu.memory_space<vmem>>, vector<128x128xf32>,
    %c1_i32 = arith.constant 1 : i32
    %77 = arith.sitofp %c1_i32 : i32 to f32
    %78 = vector.broadcast %77 : f32 to vector<128x128xf32>
    %79 = arith.subf %42, %78 : vector<128x128xf32>
    %80 = math.absf %79 : vector<128x128xf32>
    %cst_35 = arith.constant 1.000000e+00 : f32
    %81 = vector.broadcast %cst_35 : f32 to vector<128x128xf32>
    %82 = arith.subf %81, %80 : vector<128x128xf32>
    %cst_36 = arith.constant 0.000000e+00 : f32
    %83 = vector.broadcast %cst_36 : f32 to vector<128x128xf32>
    %84 = arith.maximumf %83, %82 : vector<128x128xf32>
    %85 = arith.mulf %84, %33 : vector<128x128xf32>
    %cst_37 = arith.constant dense<0.000000e+00> : vector<128xf32>
    %86 = vector.multi_reduction <add>, %85, %cst_37 [1] : vector<128x128xf32> to vector<128xf32>
    %87 = vector.shape_cast %86 : vector<128xf32> to vector<128x1xf32>
    %cst_38 = arith.constant dense<0.000000e+00> : vector<128xf32>
    %88 = vector.multi_reduction <add>, %84, %cst_38 [1] : vector<128x128xf32> to vector<128xf32>
    %89 = vector.shape_cast %88 : vector<128xf32> to vector<128x1xf32>
    %90 = vector.broadcast %c1_i32 : i32 to vector<1x128xi32>
    %91 = arith.cmpi eq, %43, %90 : vector<1x128xi32>
    %c0_39 = arith.constant 0 : index
    %c0_40 = arith.constant 0 : index
    %92 = vector.load %arg7[%c0_39, %c0_40] : memref<128x128xf32, #tpu.memory_space<vmem>>, vector<128x128xf32>
    %cst_41 = arith.constant 0.000000e+00 : f32
    %93 = vector.shape_cast %91 : vector<1x128xi1> to vector<1x128xi1>
    %94 = vector.broadcast %93 : vector<1x128xi1> to vector<128x128xi1>
    %95 = vector.shape_cast %87 : vector<128x1xf32> to vector<128x1xf32>
    %96 = vector.broadcast %95 : vector<128x1xf32> to vector<128x128xf32>
    %97 = vector.broadcast %cst_41 : f32 to vector<128x128xf32>
    %98 = arith.select %94, %96, %97 : vector<128x128xi1>, vector<128x128xf32>
    %99 = arith.addf %92, %98 : vector<128x128xf32>
    %c0_42 = arith.constant 0 : index
    %c0_43 = arith.constant 0 : index
    %100 = vector.load %arg7[%c0_42, %c0_43] : memref<128x128xf32, #tpu.memory_space<vmem>>, vector<128x128xf32>
    tpu.vector_store %arg7[%c0_42, %c0_43], %99 {strides = array<i32>} : memref<128x128xf32, #tpu.memory_space<vmem>>, vector<128x128xf32>,
    %c0_44 = arith.constant 0 : index
    %c0_45 = arith.constant 0 : index
    %101 = vector.load %arg8[%c0_44, %c0_45] : memref<128x128xf32, #tpu.memory_space<vmem>>, vector<128x128xf32>
    %cst_46 = arith.constant 0.000000e+00 : f32
    %102 = vector.shape_cast %91 : vector<1x128xi1> to vector<1x128xi1>
    %103 = vector.broadcast %102 : vector<1x128xi1> to vector<128x128xi1>
    %104 = vector.shape_cast %89 : vector<128x1xf32> to vector<128x1xf32>
    %105 = vector.broadcast %104 : vector<128x1xf32> to vector<128x128xf32>
    %106 = vector.broadcast %cst_46 : f32 to vector<128x128xf32>
    %107 = arith.select %103, %105, %106 : vector<128x128xi1>, vector<128x128xf32>
    %108 = arith.addf %101, %107 : vector<128x128xf32>
    %c0_47 = arith.constant 0 : index
    %c0_48 = arith.constant 0 : index
    %109 = vector.load %arg8[%c0_47, %c0_48] : memref<128x128xf32, #tpu.memory_space<vmem>>, vector<128x128xf32>
    tpu.vector_store %arg8[%c0_47, %c0_48], %108 {strides = array<i32>} : memref<128x128xf32, #tpu.memory_space<vmem>>, vector<128x128xf32>,
    %c2_i32 = arith.constant 2 : i32
    %110 = arith.sitofp %c2_i32 : i32 to f32
    %111 = vector.broadcast %110 : f32 to vector<128x128xf32>
    %112 = arith.subf %42, %111 : vector<128x128xf32>
    %113 = math.absf %112 : vector<128x128xf32>
    %cst_49 = arith.constant 1.000000e+00 : f32
    %114 = vector.broadcast %cst_49 : f32 to vector<128x128xf32>
    %115 = arith.subf %114, %113 : vector<128x128xf32>
    %cst_50 = arith.constant 0.000000e+00 : f32
    %116 = vector.broadcast %cst_50 : f32 to vector<128x128xf32>
    %117 = arith.maximumf %116, %115 : vector<128x128xf32>
    %118 = arith.mulf %117, %33 : vector<128x128xf32>
    %cst_51 = arith.constant dense<0.000000e+00> : vector<128xf32>
    %119 = vector.multi_reduction <add>, %118, %cst_51 [1] : vector<128x128xf32> to vector<128xf32>
    %120 = vector.shape_cast %119 : vector<128xf32> to vector<128x1xf32>
    %cst_52 = arith.constant dense<0.000000e+00> : vector<128xf32>
    %121 = vector.multi_reduction <add>, %117, %cst_52 [1] : vector<128x128xf32> to vector<128xf32>
    %122 = vector.shape_cast %121 : vector<128xf32> to vector<128x1xf32>
    %123 = vector.broadcast %c2_i32 : i32 to vector<1x128xi32>
    %124 = arith.cmpi eq, %43, %123 : vector<1x128xi32>
    %c0_53 = arith.constant 0 : index
    %c0_54 = arith.constant 0 : index
    %125 = vector.load %arg7[%c0_53, %c0_54] : memref<128x128xf32, #tpu.memory_space<vmem>>, vector<128x128xf32>
    %cst_55 = arith.constant 0.000000e+00 : f32
    %126 = vector.shape_cast %124 : vector<1x128xi1> to vector<1x128xi1>
    %127 = vector.broadcast %126 : vector<1x128xi1> to vector<128x128xi1>
    %128 = vector.shape_cast %120 : vector<128x1xf32> to vector<128x1xf32>
    %129 = vector.broadcast %128 : vector<128x1xf32> to vector<128x128xf32>
    %130 = vector.broadcast %cst_55 : f32 to vector<128x128xf32>
    %131 = arith.select %127, %129, %130 : vector<128x128xi1>, vector<128x128xf32>
    %132 = arith.addf %125, %131 : vector<128x128xf32>
    %c0_56 = arith.constant 0 : index
    %c0_57 = arith.constant 0 : index
    %133 = vector.load %arg7[%c0_56, %c0_57] : memref<128x128xf32, #tpu.memory_space<vmem>>, vector<128x128xf32>
    tpu.vector_store %arg7[%c0_56, %c0_57], %132 {strides = array<i32>} : memref<128x128xf32, #tpu.memory_space<vmem>>, vector<128x128xf32>,
    %c0_58 = arith.constant 0 : index
    %c0_59 = arith.constant 0 : index
    %134 = vector.load %arg8[%c0_58, %c0_59] : memref<128x128xf32, #tpu.memory_space<vmem>>, vector<128x128xf32>
    %cst_60 = arith.constant 0.000000e+00 : f32
    %135 = vector.shape_cast %124 : vector<1x128xi1> to vector<1x128xi1>
    %136 = vector.broadcast %135 : vector<1x128xi1> to vector<128x128xi1>
    %137 = vector.shape_cast %122 : vector<128x1xf32> to vector<128x1xf32>
    %138 = vector.broadcast %137 : vector<128x1xf32> to vector<128x128xf32>
    %139 = vector.broadcast %cst_60 : f32 to vector<128x128xf32>
    %140 = arith.select %136, %138, %139 : vector<128x128xi1>, vector<128x128xf32>
    %141 = arith.addf %134, %140 : vector<128x128xf32>
    %c0_61 = arith.constant 0 : index
    %c0_62 = arith.constant 0 : index
    %142 = vector.load %arg8[%c0_61, %c0_62] : memref<128x128xf32, #tpu.memory_space<vmem>>, vector<128x128xf32>
    tpu.vector_store %arg8[%c0_61, %c0_62], %141 {strides = array<i32>} : memref<128x128xf32, #tpu.memory_space<vmem>>, vector<128x128xf32>,
    %c3_i32 = arith.constant 3 : i32
    %143 = arith.sitofp %c3_i32 : i32 to f32
    %144 = vector.broadcast %143 : f32 to vector<128x128xf32>
    %145 = arith.subf %42, %144 : vector<128x128xf32>
    %146 = math.absf %145 : vector<128x128xf32>
    %cst_63 = arith.constant 1.000000e+00 : f32
    %147 = vector.broadcast %cst_63 : f32 to vector<128x128xf32>
    %148 = arith.subf %147, %146 : vector<128x128xf32>
    %cst_64 = arith.constant 0.000000e+00 : f32
    %149 = vector.broadcast %cst_64 : f32 to vector<128x128xf32>
    %150 = arith.maximumf %149, %148 : vector<128x128xf32>
    %151 = arith.mulf %150, %33 : vector<128x128xf32>
    %cst_65 = arith.constant dense<0.000000e+00> : vector<128xf32>
    %152 = vector.multi_reduction <add>, %151, %cst_65 [1] : vector<128x128xf32> to vector<128xf32>
    %153 = vector.shape_cast %152 : vector<128xf32> to vector<128x1xf32>
    %cst_66 = arith.constant dense<0.000000e+00> : vector<128xf32>
    %154 = vector.multi_reduction <add>, %150, %cst_66 [1] : vector<128x128xf32> to vector<128xf32>
    %155 = vector.shape_cast %154 : vector<128xf32> to vector<128x1xf32>
    %156 = vector.broadcast %c3_i32 : i32 to vector<1x128xi32>
    %157 = arith.cmpi eq, %43, %156 : vector<1x128xi32>
    %c0_67 = arith.constant 0 : index
    %c0_68 = arith.constant 0 : index
    %158 = vector.load %arg7[%c0_67, %c0_68] : memref<128x128xf32, #tpu.memory_space<vmem>>, vector<128x128xf32>
    %cst_69 = arith.constant 0.000000e+00 : f32
    %159 = vector.shape_cast %157 : vector<1x128xi1> to vector<1x128xi1>
    %160 = vector.broadcast %159 : vector<1x128xi1> to vector<128x128xi1>
    %161 = vector.shape_cast %153 : vector<128x1xf32> to vector<128x1xf32>
    %162 = vector.broadcast %161 : vector<128x1xf32> to vector<128x128xf32>
    %163 = vector.broadcast %cst_69 : f32 to vector<128x128xf32>
    %164 = arith.select %160, %162, %163 : vector<128x128xi1>, vector<128x128xf32>
    %165 = arith.addf %158, %164 : vector<128x128xf32>
    %c0_70 = arith.constant 0 : index
    %c0_71 = arith.constant 0 : index
    %166 = vector.load %arg7[%c0_70, %c0_71] : memref<128x128xf32, #tpu.memory_space<vmem>>, vector<128x128xf32>
    tpu.vector_store %arg7[%c0_70, %c0_71], %165 {strides = array<i32>} : memref<128x128xf32, #tpu.memory_space<vmem>>, vector<128x128xf32>,
    %c0_72 = arith.constant 0 : index
    %c0_73 = arith.constant 0 : index
    %167 = vector.load %arg8[%c0_72, %c0_73] : memref<128x128xf32, #tpu.memory_space<vmem>>, vector<128x128xf32>
    %cst_74 = arith.constant 0.000000e+00 : f32
    %168 = vector.shape_cast %157 : vector<1x128xi1> to vector<1x128xi1>
    %169 = vector.broadcast %168 : vector<1x128xi1> to vector<128x128xi1>
    %170 = vector.shape_cast %155 : vector<128x1xf32> to vector<128x1xf32>
    %171 = vector.broadcast %170 : vector<128x1xf32> to vector<128x128xf32>
    %172 = vector.broadcast %cst_74 : f32 to vector<128x128xf32>
    %173 = arith.select %169, %171, %172 : vector<128x128xi1>, vector<128x128xf32>
    %174 = arith.addf %167, %173 : vector<128x128xf32>
    %c0_75 = arith.constant 0 : index
    %c0_76 = arith.constant 0 : index
    %175 = vector.load %arg8[%c0_75, %c0_76] : memref<128x128xf32, #tpu.memory_space<vmem>>, vector<128x128xf32>
    tpu.vector_store %arg8[%c0_75, %c0_76], %174 {strides = array<i32>} : memref<128x128xf32, #tpu.memory_space<vmem>>, vector<128x128xf32>,
    %c4_i32 = arith.constant 4 : i32
    %176 = arith.sitofp %c4_i32 : i32 to f32
    %177 = vector.broadcast %176 : f32 to vector<128x128xf32>
    %178 = arith.subf %42, %177 : vector<128x128xf32>
    %179 = math.absf %178 : vector<128x128xf32>
    %cst_77 = arith.constant 1.000000e+00 : f32
    %180 = vector.broadcast %cst_77 : f32 to vector<128x128xf32>
    %181 = arith.subf %180, %179 : vector<128x128xf32>
    %cst_78 = arith.constant 0.000000e+00 : f32
    %182 = vector.broadcast %cst_78 : f32 to vector<128x128xf32>
    %183 = arith.maximumf %182, %181 : vector<128x128xf32>
    %184 = arith.mulf %183, %33 : vector<128x128xf32>
    %cst_79 = arith.constant dense<0.000000e+00> : vector<128xf32>
    %185 = vector.multi_reduction <add>, %184, %cst_79 [1] : vector<128x128xf32> to vector<128xf32>
    %186 = vector.shape_cast %185 : vector<128xf32> to vector<128x1xf32>
    %cst_80 = arith.constant dense<0.000000e+00> : vector<128xf32>
    %187 = vector.multi_reduction <add>, %183, %cst_80 [1] : vector<128x128xf32> to vector<128xf32>
    %188 = vector.shape_cast %187 : vector<128xf32> to vector<128x1xf32>
    %189 = vector.broadcast %c4_i32 : i32 to vector<1x128xi32>
    %190 = arith.cmpi eq, %43, %189 : vector<1x128xi32>
    %c0_81 = arith.constant 0 : index
    %c0_82 = arith.constant 0 : index
    %191 = vector.load %arg7[%c0_81, %c0_82] : memref<128x128xf32, #tpu.memory_space<vmem>>, vector<128x128xf32>
    %cst_83 = arith.constant 0.000000e+00 : f32
    %192 = vector.shape_cast %190 : vector<1x128xi1> to vector<1x128xi1>
    %193 = vector.broadcast %192 : vector<1x128xi1> to vector<128x128xi1>
    %194 = vector.shape_cast %186 : vector<128x1xf32> to vector<128x1xf32>
    %195 = vector.broadcast %194 : vector<128x1xf32> to vector<128x128xf32>
    %196 = vector.broadcast %cst_83 : f32 to vector<128x128xf32>
    %197 = arith.select %193, %195, %196 : vector<128x128xi1>, vector<128x128xf32>
    %198 = arith.addf %191, %197 : vector<128x128xf32>
    %c0_84 = arith.constant 0 : index
    %c0_85 = arith.constant 0 : index
    %199 = vector.load %arg7[%c0_84, %c0_85] : memref<128x128xf32, #tpu.memory_space<vmem>>, vector<128x128xf32>
    tpu.vector_store %arg7[%c0_84, %c0_85], %198 {strides = array<i32>} : memref<128x128xf32, #tpu.memory_space<vmem>>, vector<128x128xf32>,
    %c0_86 = arith.constant 0 : index
    %c0_87 = arith.constant 0 : index
    %200 = vector.load %arg8[%c0_86, %c0_87] : memref<128x128xf32, #tpu.memory_space<vmem>>, vector<128x128xf32>
    %cst_88 = arith.constant 0.000000e+00 : f32
    %201 = vector.shape_cast %190 : vector<1x128xi1> to vector<1x128xi1>
    %202 = vector.broadcast %201 : vector<1x128xi1> to vector<128x128xi1>
    %203 = vector.shape_cast %188 : vector<128x1xf32> to vector<128x1xf32>
    %204 = vector.broadcast %203 : vector<128x1xf32> to vector<128x128xf32>
    %205 = vector.broadcast %cst_88 : f32 to vector<128x128xf32>
    %206 = arith.select %202, %204, %205 : vector<128x128xi1>, vector<128x128xf32>
    %207 = arith.addf %200, %206 : vector<128x128xf32>
    %c0_89 = arith.constant 0 : index
    %c0_90 = arith.constant 0 : index
    %208 = vector.load %arg8[%c0_89, %c0_90] : memref<128x128xf32, #tpu.memory_space<vmem>>, vector<128x128xf32>
    tpu.vector_store %arg8[%c0_89, %c0_90], %207 {strides = array<i32>} : memref<128x128xf32, #tpu.memory_space<vmem>>, vector<128x128xf32>,
    %c5_i32 = arith.constant 5 : i32
    %209 = arith.sitofp %c5_i32 : i32 to f32
    %210 = vector.broadcast %209 : f32 to vector<128x128xf32>
    %211 = arith.subf %42, %210 : vector<128x128xf32>
    %212 = math.absf %211 : vector<128x128xf32>
    %cst_91 = arith.constant 1.000000e+00 : f32
    %213 = vector.broadcast %cst_91 : f32 to vector<128x128xf32>
    %214 = arith.subf %213, %212 : vector<128x128xf32>
    %cst_92 = arith.constant 0.000000e+00 : f32
    %215 = vector.broadcast %cst_92 : f32 to vector<128x128xf32>
    %216 = arith.maximumf %215, %214 : vector<128x128xf32>
    %217 = arith.mulf %216, %33 : vector<128x128xf32>
    %cst_93 = arith.constant dense<0.000000e+00> : vector<128xf32>
    %218 = vector.multi_reduction <add>, %217, %cst_93 [1] : vector<128x128xf32> to vector<128xf32>
    %219 = vector.shape_cast %218 : vector<128xf32> to vector<128x1xf32>
    %cst_94 = arith.constant dense<0.000000e+00> : vector<128xf32>
    %220 = vector.multi_reduction <add>, %216, %cst_94 [1] : vector<128x128xf32> to vector<128xf32>
    %221 = vector.shape_cast %220 : vector<128xf32> to vector<128x1xf32>
    %222 = vector.broadcast %c5_i32 : i32 to vector<1x128xi32>
    %223 = arith.cmpi eq, %43, %222 : vector<1x128xi32>
    %c0_95 = arith.constant 0 : index
    %c0_96 = arith.constant 0 : index
    %224 = vector.load %arg7[%c0_95, %c0_96] : memref<128x128xf32, #tpu.memory_space<vmem>>, vector<128x128xf32>
    %cst_97 = arith.constant 0.000000e+00 : f32
    %225 = vector.shape_cast %223 : vector<1x128xi1> to vector<1x128xi1>
    %226 = vector.broadcast %225 : vector<1x128xi1> to vector<128x128xi1>
    %227 = vector.shape_cast %219 : vector<128x1xf32> to vector<128x1xf32>
    %228 = vector.broadcast %227 : vector<128x1xf32> to vector<128x128xf32>
    %229 = vector.broadcast %cst_97 : f32 to vector<128x128xf32>
    %230 = arith.select %226, %228, %229 : vector<128x128xi1>, vector<128x128xf32>
    %231 = arith.addf %224, %230 : vector<128x128xf32>
    %c0_98 = arith.constant 0 : index
    %c0_99 = arith.constant 0 : index
    %232 = vector.load %arg7[%c0_98, %c0_99] : memref<128x128xf32, #tpu.memory_space<vmem>>, vector<128x128xf32>
    tpu.vector_store %arg7[%c0_98, %c0_99], %231 {strides = array<i32>} : memref<128x128xf32, #tpu.memory_space<vmem>>, vector<128x128xf32>,
    %c0_100 = arith.constant 0 : index
    %c0_101 = arith.constant 0 : index
    %233 = vector.load %arg8[%c0_100, %c0_101] : memref<128x128xf32, #tpu.memory_space<vmem>>, vector<128x128xf32>
    %cst_102 = arith.constant 0.000000e+00 : f32
    %234 = vector.shape_cast %223 : vector<1x128xi1> to vector<1x128xi1>
    %235 = vector.broadcast %234 : vector<1x128xi1> to vector<128x128xi1>
    %236 = vector.shape_cast %221 : vector<128x1xf32> to vector<128x1xf32>
    %237 = vector.broadcast %236 : vector<128x1xf32> to vector<128x128xf32>
    %238 = vector.broadcast %cst_102 : f32 to vector<128x128xf32>
    %239 = arith.select %235, %237, %238 : vector<128x128xi1>, vector<128x128xf32>
    %240 = arith.addf %233, %239 : vector<128x128xf32>
    %c0_103 = arith.constant 0 : index
    %c0_104 = arith.constant 0 : index
    %241 = vector.load %arg8[%c0_103, %c0_104] : memref<128x128xf32, #tpu.memory_space<vmem>>, vector<128x128xf32>
    tpu.vector_store %arg8[%c0_103, %c0_104], %240 {strides = array<i32>} : memref<128x128xf32, #tpu.memory_space<vmem>>, vector<128x128xf32>,
    %c6_i32 = arith.constant 6 : i32
    %242 = arith.sitofp %c6_i32 : i32 to f32
    %243 = vector.broadcast %242 : f32 to vector<128x128xf32>
    %244 = arith.subf %42, %243 : vector<128x128xf32>
    %245 = math.absf %244 : vector<128x128xf32>
    %cst_105 = arith.constant 1.000000e+00 : f32
    %246 = vector.broadcast %cst_105 : f32 to vector<128x128xf32>
    %247 = arith.subf %246, %245 : vector<128x128xf32>
    %cst_106 = arith.constant 0.000000e+00 : f32
    %248 = vector.broadcast %cst_106 : f32 to vector<128x128xf32>
    %249 = arith.maximumf %248, %247 : vector<128x128xf32>
    %250 = arith.mulf %249, %33 : vector<128x128xf32>
    %cst_107 = arith.constant dense<0.000000e+00> : vector<128xf32>
    %251 = vector.multi_reduction <add>, %250, %cst_107 [1] : vector<128x128xf32> to vector<128xf32>
    %252 = vector.shape_cast %251 : vector<128xf32> to vector<128x1xf32>
    %cst_108 = arith.constant dense<0.000000e+00> : vector<128xf32>
    %253 = vector.multi_reduction <add>, %249, %cst_108 [1] : vector<128x128xf32> to vector<128xf32>
    %254 = vector.shape_cast %253 : vector<128xf32> to vector<128x1xf32>
    %255 = vector.broadcast %c6_i32 : i32 to vector<1x128xi32>
    %256 = arith.cmpi eq, %43, %255 : vector<1x128xi32>
    %c0_109 = arith.constant 0 : index
    %c0_110 = arith.constant 0 : index
    %257 = vector.load %arg7[%c0_109, %c0_110] : memref<128x128xf32, #tpu.memory_space<vmem>>, vector<128x128xf32>
    %cst_111 = arith.constant 0.000000e+00 : f32
    %258 = vector.shape_cast %256 : vector<1x128xi1> to vector<1x128xi1>
    %259 = vector.broadcast %258 : vector<1x128xi1> to vector<128x128xi1>
    %260 = vector.shape_cast %252 : vector<128x1xf32> to vector<128x1xf32>
    %261 = vector.broadcast %260 : vector<128x1xf32> to vector<128x128xf32>
    %262 = vector.broadcast %cst_111 : f32 to vector<128x128xf32>
    %263 = arith.select %259, %261, %262 : vector<128x128xi1>, vector<128x128xf32>
    %264 = arith.addf %257, %263 : vector<128x128xf32>
    %c0_112 = arith.constant 0 : index
    %c0_113 = arith.constant 0 : index
    %265 = vector.load %arg7[%c0_112, %c0_113] : memref<128x128xf32, #tpu.memory_space<vmem>>, vector<128x128xf32>
    tpu.vector_store %arg7[%c0_112, %c0_113], %264 {strides = array<i32>} : memref<128x128xf32, #tpu.memory_space<vmem>>, vector<128x128xf32>,
    %c0_114 = arith.constant 0 : index
    %c0_115 = arith.constant 0 : index
    %266 = vector.load %arg8[%c0_114, %c0_115] : memref<128x128xf32, #tpu.memory_space<vmem>>, vector<128x128xf32>
    %cst_116 = arith.constant 0.000000e+00 : f32
    %267 = vector.shape_cast %256 : vector<1x128xi1> to vector<1x128xi1>
    %268 = vector.broadcast %267 : vector<1x128xi1> to vector<128x128xi1>
    %269 = vector.shape_cast %254 : vector<128x1xf32> to vector<128x1xf32>
    %270 = vector.broadcast %269 : vector<128x1xf32> to vector<128x128xf32>
    %271 = vector.broadcast %cst_116 : f32 to vector<128x128xf32>
    %272 = arith.select %268, %270, %271 : vector<128x128xi1>, vector<128x128xf32>
    %273 = arith.addf %266, %272 : vector<128x128xf32>
    %c0_117 = arith.constant 0 : index
    %c0_118 = arith.constant 0 : index
    %274 = vector.load %arg8[%c0_117, %c0_118] : memref<128x128xf32, #tpu.memory_space<vmem>>, vector<128x128xf32>
    tpu.vector_store %arg8[%c0_117, %c0_118], %273 {strides = array<i32>} : memref<128x128xf32, #tpu.memory_space<vmem>>, vector<128x128xf32>,
    %c7_i32 = arith.constant 7 : i32
    %275 = arith.sitofp %c7_i32 : i32 to f32
    %276 = vector.broadcast %275 : f32 to vector<128x128xf32>
    %277 = arith.subf %42, %276 : vector<128x128xf32>
    %278 = math.absf %277 : vector<128x128xf32>
    %cst_119 = arith.constant 1.000000e+00 : f32
    %279 = vector.broadcast %cst_119 : f32 to vector<128x128xf32>
    %280 = arith.subf %279, %278 : vector<128x128xf32>
    %cst_120 = arith.constant 0.000000e+00 : f32
    %281 = vector.broadcast %cst_120 : f32 to vector<128x128xf32>
    %282 = arith.maximumf %281, %280 : vector<128x128xf32>
    %283 = arith.mulf %282, %33 : vector<128x128xf32>
    %cst_121 = arith.constant dense<0.000000e+00> : vector<128xf32>
    %284 = vector.multi_reduction <add>, %283, %cst_121 [1] : vector<128x128xf32> to vector<128xf32>
    %285 = vector.shape_cast %284 : vector<128xf32> to vector<128x1xf32>
    %cst_122 = arith.constant dense<0.000000e+00> : vector<128xf32>
    %286 = vector.multi_reduction <add>, %282, %cst_122 [1] : vector<128x128xf32> to vector<128xf32>
    %287 = vector.shape_cast %286 : vector<128xf32> to vector<128x1xf32>
    %288 = vector.broadcast %c7_i32 : i32 to vector<1x128xi32>
    %289 = arith.cmpi eq, %43, %288 : vector<1x128xi32>
    %c0_123 = arith.constant 0 : index
    %c0_124 = arith.constant 0 : index
    %290 = vector.load %arg7[%c0_123, %c0_124] : memref<128x128xf32, #tpu.memory_space<vmem>>, vector<128x128xf32>
    %cst_125 = arith.constant 0.000000e+00 : f32
    %291 = vector.shape_cast %289 : vector<1x128xi1> to vector<1x128xi1>
    %292 = vector.broadcast %291 : vector<1x128xi1> to vector<128x128xi1>
    %293 = vector.shape_cast %285 : vector<128x1xf32> to vector<128x1xf32>
    %294 = vector.broadcast %293 : vector<128x1xf32> to vector<128x128xf32>
    %295 = vector.broadcast %cst_125 : f32 to vector<128x128xf32>
    %296 = arith.select %292, %294, %295 : vector<128x128xi1>, vector<128x128xf32>
    %297 = arith.addf %290, %296 : vector<128x128xf32>
    %c0_126 = arith.constant 0 : index
    %c0_127 = arith.constant 0 : index
    %298 = vector.load %arg7[%c0_126, %c0_127] : memref<128x128xf32, #tpu.memory_space<vmem>>, vector<128x128xf32>
    tpu.vector_store %arg7[%c0_126, %c0_127], %297 {strides = array<i32>} : memref<128x128xf32, #tpu.memory_space<vmem>>, vector<128x128xf32>,
    %c0_128 = arith.constant 0 : index
    %c0_129 = arith.constant 0 : index
    %299 = vector.load %arg8[%c0_128, %c0_129] : memref<128x128xf32, #tpu.memory_space<vmem>>, vector<128x128xf32>
    %cst_130 = arith.constant 0.000000e+00 : f32
    %300 = vector.shape_cast %289 : vector<1x128xi1> to vector<1x128xi1>
    %301 = vector.broadcast %300 : vector<1x128xi1> to vector<128x128xi1>
    %302 = vector.shape_cast %287 : vector<128x1xf32> to vector<128x1xf32>
    %303 = vector.broadcast %302 : vector<128x1xf32> to vector<128x128xf32>
    %304 = vector.broadcast %cst_130 : f32 to vector<128x128xf32>
    %305 = arith.select %301, %303, %304 : vector<128x128xi1>, vector<128x128xf32>
    %306 = arith.addf %299, %305 : vector<128x128xf32>
    %c0_131 = arith.constant 0 : index
    %c0_132 = arith.constant 0 : index
    %307 = vector.load %arg8[%c0_131, %c0_132] : memref<128x128xf32, #tpu.memory_space<vmem>>, vector<128x128xf32>
    tpu.vector_store %arg8[%c0_131, %c0_132], %306 {strides = array<i32>} : memref<128x128xf32, #tpu.memory_space<vmem>>, vector<128x128xf32>,
    %c8_i32_133 = arith.constant 8 : i32
    %308 = arith.sitofp %c8_i32_133 : i32 to f32
    %309 = vector.broadcast %308 : f32 to vector<128x128xf32>
    %310 = arith.subf %42, %309 : vector<128x128xf32>
    %311 = math.absf %310 : vector<128x128xf32>
    %cst_134 = arith.constant 1.000000e+00 : f32
    %312 = vector.broadcast %cst_134 : f32 to vector<128x128xf32>
    %313 = arith.subf %312, %311 : vector<128x128xf32>
    %cst_135 = arith.constant 0.000000e+00 : f32
    %314 = vector.broadcast %cst_135 : f32 to vector<128x128xf32>
    %315 = arith.maximumf %314, %313 : vector<128x128xf32>
    %316 = arith.mulf %315, %33 : vector<128x128xf32>
    %cst_136 = arith.constant dense<0.000000e+00> : vector<128xf32>
    %317 = vector.multi_reduction <add>, %316, %cst_136 [1] : vector<128x128xf32> to vector<128xf32>
    %318 = vector.shape_cast %317 : vector<128xf32> to vector<128x1xf32>
    %cst_137 = arith.constant dense<0.000000e+00> : vector<128xf32>
    %319 = vector.multi_reduction <add>, %315, %cst_137 [1] : vector<128x128xf32> to vector<128xf32>
    %320 = vector.shape_cast %319 : vector<128xf32> to vector<128x1xf32>
    %321 = vector.broadcast %c8_i32_133 : i32 to vector<1x128xi32>
    %322 = arith.cmpi eq, %43, %321 : vector<1x128xi32>
    %c0_138 = arith.constant 0 : index
    %c0_139 = arith.constant 0 : index
    %323 = vector.load %arg7[%c0_138, %c0_139] : memref<128x128xf32, #tpu.memory_space<vmem>>, vector<128x128xf32>
    %cst_140 = arith.constant 0.000000e+00 : f32
    %324 = vector.shape_cast %322 : vector<1x128xi1> to vector<1x128xi1>
    %325 = vector.broadcast %324 : vector<1x128xi1> to vector<128x128xi1>
    %326 = vector.shape_cast %318 : vector<128x1xf32> to vector<128x1xf32>
    %327 = vector.broadcast %326 : vector<128x1xf32> to vector<128x128xf32>
    %328 = vector.broadcast %cst_140 : f32 to vector<128x128xf32>
    %329 = arith.select %325, %327, %328 : vector<128x128xi1>, vector<128x128xf32>
    %330 = arith.addf %323, %329 : vector<128x128xf32>
    %c0_141 = arith.constant 0 : index
    %c0_142 = arith.constant 0 : index
    %331 = vector.load %arg7[%c0_141, %c0_142] : memref<128x128xf32, #tpu.memory_space<vmem>>, vector<128x128xf32>
    tpu.vector_store %arg7[%c0_141, %c0_142], %330 {strides = array<i32>} : memref<128x128xf32, #tpu.memory_space<vmem>>, vector<128x128xf32>,
    %c0_143 = arith.constant 0 : index
    %c0_144 = arith.constant 0 : index
    %332 = vector.load %arg8[%c0_143, %c0_144] : memref<128x128xf32, #tpu.memory_space<vmem>>, vector<128x128xf32>
    %cst_145 = arith.constant 0.000000e+00 : f32
    %333 = vector.shape_cast %322 : vector<1x128xi1> to vector<1x128xi1>
    %334 = vector.broadcast %333 : vector<1x128xi1> to vector<128x128xi1>
    %335 = vector.shape_cast %320 : vector<128x1xf32> to vector<128x1xf32>
    %336 = vector.broadcast %335 : vector<128x1xf32> to vector<128x128xf32>
    %337 = vector.broadcast %cst_145 : f32 to vector<128x128xf32>
    %338 = arith.select %334, %336, %337 : vector<128x128xi1>, vector<128x128xf32>
    %339 = arith.addf %332, %338 : vector<128x128xf32>
    %c0_146 = arith.constant 0 : index
    %c0_147 = arith.constant 0 : index
    %340 = vector.load %arg8[%c0_146, %c0_147] : memref<128x128xf32, #tpu.memory_space<vmem>>, vector<128x128xf32>
    tpu.vector_store %arg8[%c0_146, %c0_147], %339 {strides = array<i32>} : memref<128x128xf32, #tpu.memory_space<vmem>>, vector<128x128xf32>,
    %c9_i32 = arith.constant 9 : i32
    %341 = arith.sitofp %c9_i32 : i32 to f32
    %342 = vector.broadcast %341 : f32 to vector<128x128xf32>
    %343 = arith.subf %42, %342 : vector<128x128xf32>
    %344 = math.absf %343 : vector<128x128xf32>
    %cst_148 = arith.constant 1.000000e+00 : f32
    %345 = vector.broadcast %cst_148 : f32 to vector<128x128xf32>
    %346 = arith.subf %345, %344 : vector<128x128xf32>
    %cst_149 = arith.constant 0.000000e+00 : f32
    %347 = vector.broadcast %cst_149 : f32 to vector<128x128xf32>
    %348 = arith.maximumf %347, %346 : vector<128x128xf32>
    %349 = arith.mulf %348, %33 : vector<128x128xf32>
    %cst_150 = arith.constant dense<0.000000e+00> : vector<128xf32>
    %350 = vector.multi_reduction <add>, %349, %cst_150 [1] : vector<128x128xf32> to vector<128xf32>
    %351 = vector.shape_cast %350 : vector<128xf32> to vector<128x1xf32>
    %cst_151 = arith.constant dense<0.000000e+00> : vector<128xf32>
    %352 = vector.multi_reduction <add>, %348, %cst_151 [1] : vector<128x128xf32> to vector<128xf32>
    %353 = vector.shape_cast %352 : vector<128xf32> to vector<128x1xf32>
    %354 = vector.broadcast %c9_i32 : i32 to vector<1x128xi32>
    %355 = arith.cmpi eq, %43, %354 : vector<1x128xi32>
    %c0_152 = arith.constant 0 : index
    %c0_153 = arith.constant 0 : index
    %356 = vector.load %arg7[%c0_152, %c0_153] : memref<128x128xf32, #tpu.memory_space<vmem>>, vector<128x128xf32>
    %cst_154 = arith.constant 0.000000e+00 : f32
    %357 = vector.shape_cast %355 : vector<1x128xi1> to vector<1x128xi1>
    %358 = vector.broadcast %357 : vector<1x128xi1> to vector<128x128xi1>
    %359 = vector.shape_cast %351 : vector<128x1xf32> to vector<128x1xf32>
    %360 = vector.broadcast %359 : vector<128x1xf32> to vector<128x128xf32>
    %361 = vector.broadcast %cst_154 : f32 to vector<128x128xf32>
    %362 = arith.select %358, %360, %361 : vector<128x128xi1>, vector<128x128xf32>
    %363 = arith.addf %356, %362 : vector<128x128xf32>
    %c0_155 = arith.constant 0 : index
    %c0_156 = arith.constant 0 : index
    %364 = vector.load %arg7[%c0_155, %c0_156] : memref<128x128xf32, #tpu.memory_space<vmem>>, vector<128x128xf32>
    tpu.vector_store %arg7[%c0_155, %c0_156], %363 {strides = array<i32>} : memref<128x128xf32, #tpu.memory_space<vmem>>, vector<128x128xf32>,
    %c0_157 = arith.constant 0 : index
    %c0_158 = arith.constant 0 : index
    %365 = vector.load %arg8[%c0_157, %c0_158] : memref<128x128xf32, #tpu.memory_space<vmem>>, vector<128x128xf32>
    %cst_159 = arith.constant 0.000000e+00 : f32
    %366 = vector.shape_cast %355 : vector<1x128xi1> to vector<1x128xi1>
    %367 = vector.broadcast %366 : vector<1x128xi1> to vector<128x128xi1>
    %368 = vector.shape_cast %353 : vector<128x1xf32> to vector<128x1xf32>
    %369 = vector.broadcast %368 : vector<128x1xf32> to vector<128x128xf32>
    %370 = vector.broadcast %cst_159 : f32 to vector<128x128xf32>
    %371 = arith.select %367, %369, %370 : vector<128x128xi1>, vector<128x128xf32>
    %372 = arith.addf %365, %371 : vector<128x128xf32>
    %c0_160 = arith.constant 0 : index
    %c0_161 = arith.constant 0 : index
    %373 = vector.load %arg8[%c0_160, %c0_161] : memref<128x128xf32, #tpu.memory_space<vmem>>, vector<128x128xf32>
    tpu.vector_store %arg8[%c0_160, %c0_161], %372 {strides = array<i32>} : memref<128x128xf32, #tpu.memory_space<vmem>>, vector<128x128xf32>,
    %c10_i32 = arith.constant 10 : i32
    %374 = arith.sitofp %c10_i32 : i32 to f32
    %375 = vector.broadcast %374 : f32 to vector<128x128xf32>
    %376 = arith.subf %42, %375 : vector<128x128xf32>
    %377 = math.absf %376 : vector<128x128xf32>
    %cst_162 = arith.constant 1.000000e+00 : f32
    %378 = vector.broadcast %cst_162 : f32 to vector<128x128xf32>
    %379 = arith.subf %378, %377 : vector<128x128xf32>
    %cst_163 = arith.constant 0.000000e+00 : f32
    %380 = vector.broadcast %cst_163 : f32 to vector<128x128xf32>
    %381 = arith.maximumf %380, %379 : vector<128x128xf32>
    %382 = arith.mulf %381, %33 : vector<128x128xf32>
    %cst_164 = arith.constant dense<0.000000e+00> : vector<128xf32>
    %383 = vector.multi_reduction <add>, %382, %cst_164 [1] : vector<128x128xf32> to vector<128xf32>
    %384 = vector.shape_cast %383 : vector<128xf32> to vector<128x1xf32>
    %cst_165 = arith.constant dense<0.000000e+00> : vector<128xf32>
    %385 = vector.multi_reduction <add>, %381, %cst_165 [1] : vector<128x128xf32> to vector<128xf32>
    %386 = vector.shape_cast %385 : vector<128xf32> to vector<128x1xf32>
    %387 = vector.broadcast %c10_i32 : i32 to vector<1x128xi32>
    %388 = arith.cmpi eq, %43, %387 : vector<1x128xi32>
    %c0_166 = arith.constant 0 : index
    %c0_167 = arith.constant 0 : index
    %389 = vector.load %arg7[%c0_166, %c0_167] : memref<128x128xf32, #tpu.memory_space<vmem>>, vector<128x128xf32>
    %cst_168 = arith.constant 0.000000e+00 : f32
    %390 = vector.shape_cast %388 : vector<1x128xi1> to vector<1x128xi1>
    %391 = vector.broadcast %390 : vector<1x128xi1> to vector<128x128xi1>
    %392 = vector.shape_cast %384 : vector<128x1xf32> to vector<128x1xf32>
    %393 = vector.broadcast %392 : vector<128x1xf32> to vector<128x128xf32>
    %394 = vector.broadcast %cst_168 : f32 to vector<128x128xf32>
    %395 = arith.select %391, %393, %394 : vector<128x128xi1>, vector<128x128xf32>
    %396 = arith.addf %389, %395 : vector<128x128xf32>
    %c0_169 = arith.constant 0 : index
    %c0_170 = arith.constant 0 : index
    %397 = vector.load %arg7[%c0_169, %c0_170] : memref<128x128xf32, #tpu.memory_space<vmem>>, vector<128x128xf32>
    tpu.vector_store %arg7[%c0_169, %c0_170], %396 {strides = array<i32>} : memref<128x128xf32, #tpu.memory_space<vmem>>, vector<128x128xf32>,
    %c0_171 = arith.constant 0 : index
    %c0_172 = arith.constant 0 : index
    %398 = vector.load %arg8[%c0_171, %c0_172] : memref<128x128xf32, #tpu.memory_space<vmem>>, vector<128x128xf32>
    %cst_173 = arith.constant 0.000000e+00 : f32
    %399 = vector.shape_cast %388 : vector<1x128xi1> to vector<1x128xi1>
    %400 = vector.broadcast %399 : vector<1x128xi1> to vector<128x128xi1>
    %401 = vector.shape_cast %386 : vector<128x1xf32> to vector<128x1xf32>
    %402 = vector.broadcast %401 : vector<128x1xf32> to vector<128x128xf32>
    %403 = vector.broadcast %cst_173 : f32 to vector<128x128xf32>
    %404 = arith.select %400, %402, %403 : vector<128x128xi1>, vector<128x128xf32>
    %405 = arith.addf %398, %404 : vector<128x128xf32>
    %c0_174 = arith.constant 0 : index
    %c0_175 = arith.constant 0 : index
    %406 = vector.load %arg8[%c0_174, %c0_175] : memref<128x128xf32, #tpu.memory_space<vmem>>, vector<128x128xf32>
    tpu.vector_store %arg8[%c0_174, %c0_175], %405 {strides = array<i32>} : memref<128x128xf32, #tpu.memory_space<vmem>>, vector<128x128xf32>,
    %c11_i32 = arith.constant 11 : i32
    %c0_i32_176 = arith.constant 0 : i32
    %407 = arith.cmpi eq, %arg1, %c0_i32_176 : i32
    %408 = arith.extui %407 : i1 to i32
    %c0_i32_177 = arith.constant 0 : i32
    %409 = arith.cmpi ne, %408, %c0_i32_177 : i32
    scf.if %409 {
      %c0_178 = arith.constant 0 : index
      %c0_179 = arith.constant 0 : index
      %410 = vector.load %arg7[%c0_178, %c0_179] : memref<128x128xf32, #tpu.memory_space<vmem>>, vector<128x128xf32>
      %c0_180 = arith.constant 0 : index
      %c0_181 = arith.constant 0 : index
      %411 = vector.load %arg8[%c0_180, %c0_181] : memref<128x128xf32, #tpu.memory_space<vmem>>, vector<128x128xf32>
      %c0_182 = arith.constant 0 : index
      %c0_183 = arith.constant 0 : index
      %412 = vector.load %arg9[%c0_182, %c0_183] : memref<128x1xf32, #tpu.memory_space<vmem>>, vector<128x1xf32>
      %cst_184 = arith.constant 0.000000e+00 : f32
      %413 = vector.broadcast %cst_184 : f32 to vector<128x1xf32>
      %cst_185 = arith.constant 0.000000e+00 : f32
      %414 = vector.broadcast %cst_185 : f32 to vector<128x1xf32>
      %cst_186 = arith.constant 0.000000e+00 : f32
      %415 = vector.broadcast %cst_186 : f32 to vector<128x1xf32>
      %416 = vector.extract_strided_slice %410 {offsets = [0, 0], sizes = [128, 1], strides = [1, 1]} : vector<128x128xf32> to vector<128x1xf32>
      %417 = vector.extract_strided_slice %411 {offsets = [0, 0], sizes = [128, 1], strides = [1, 1]} : vector<128x128xf32> to vector<128x1xf32>
      %418 = arith.addf %413, %416 : vector<128x1xf32>
      %419 = arith.addf %414, %417 : vector<128x1xf32>
      %cst_187 = arith.constant 0.000000e+00 : f32
      %420 = vector.broadcast %cst_187 : f32 to vector<128x1xf32>
      %421 = arith.cmpf ogt, %419, %420 : vector<128x1xf32>
      %422 = arith.mulf %416, %418 : vector<128x1xf32>
      %423 = arith.divf %422, %419 : vector<128x1xf32>
      %cst_188 = arith.constant 0.000000e+00 : f32
      %424 = vector.broadcast %cst_188 : f32 to vector<128x1xf32>
      %425 = arith.select %421, %423, %424 : vector<128x1xi1>, vector<128x1xf32>
      %426 = arith.addf %415, %425 : vector<128x1xf32>
      %427 = vector.extract_strided_slice %410 {offsets = [0, 1], sizes = [128, 1], strides = [1, 1]} : vector<128x128xf32> to vector<128x1xf32>
      %428 = vector.extract_strided_slice %411 {offsets = [0, 1], sizes = [128, 1], strides = [1, 1]} : vector<128x128xf32> to vector<128x1xf32>
      %429 = arith.addf %418, %427 : vector<128x1xf32>
      %430 = arith.addf %419, %428 : vector<128x1xf32>
      %cst_189 = arith.constant 0.000000e+00 : f32
      %431 = vector.broadcast %cst_189 : f32 to vector<128x1xf32>
      %432 = arith.cmpf ogt, %430, %431 : vector<128x1xf32>
      %433 = arith.mulf %427, %429 : vector<128x1xf32>
      %434 = arith.divf %433, %430 : vector<128x1xf32>
      %cst_190 = arith.constant 0.000000e+00 : f32
      %435 = vector.broadcast %cst_190 : f32 to vector<128x1xf32>
      %436 = arith.select %432, %434, %435 : vector<128x1xi1>, vector<128x1xf32>
      %437 = arith.addf %426, %436 : vector<128x1xf32>
      %438 = vector.extract_strided_slice %410 {offsets = [0, 2], sizes = [128, 1], strides = [1, 1]} : vector<128x128xf32> to vector<128x1xf32>
      %439 = vector.extract_strided_slice %411 {offsets = [0, 2], sizes = [128, 1], strides = [1, 1]} : vector<128x128xf32> to vector<128x1xf32>
      %440 = arith.addf %429, %438 : vector<128x1xf32>
      %441 = arith.addf %430, %439 : vector<128x1xf32>
      %cst_191 = arith.constant 0.000000e+00 : f32
      %442 = vector.broadcast %cst_191 : f32 to vector<128x1xf32>
      %443 = arith.cmpf ogt, %441, %442 : vector<128x1xf32>
      %444 = arith.mulf %438, %440 : vector<128x1xf32>
      %445 = arith.divf %444, %441 : vector<128x1xf32>
      %cst_192 = arith.constant 0.000000e+00 : f32
      %446 = vector.broadcast %cst_192 : f32 to vector<128x1xf32>
      %447 = arith.select %443, %445, %446 : vector<128x1xi1>, vector<128x1xf32>
      %448 = arith.addf %437, %447 : vector<128x1xf32>
      %449 = vector.extract_strided_slice %410 {offsets = [0, 3], sizes = [128, 1], strides = [1, 1]} : vector<128x128xf32> to vector<128x1xf32>
      %450 = vector.extract_strided_slice %411 {offsets = [0, 3], sizes = [128, 1], strides = [1, 1]} : vector<128x128xf32> to vector<128x1xf32>
      %451 = arith.addf %440, %449 : vector<128x1xf32>
      %452 = arith.addf %441, %450 : vector<128x1xf32>
      %cst_193 = arith.constant 0.000000e+00 : f32
      %453 = vector.broadcast %cst_193 : f32 to vector<128x1xf32>
      %454 = arith.cmpf ogt, %452, %453 : vector<128x1xf32>
      %455 = arith.mulf %449, %451 : vector<128x1xf32>
      %456 = arith.divf %455, %452 : vector<128x1xf32>
      %cst_194 = arith.constant 0.000000e+00 : f32
      %457 = vector.broadcast %cst_194 : f32 to vector<128x1xf32>
      %458 = arith.select %454, %456, %457 : vector<128x1xi1>, vector<128x1xf32>
      %459 = arith.addf %448, %458 : vector<128x1xf32>
      %460 = vector.extract_strided_slice %410 {offsets = [0, 4], sizes = [128, 1], strides = [1, 1]} : vector<128x128xf32> to vector<128x1xf32>
      %461 = vector.extract_strided_slice %411 {offsets = [0, 4], sizes = [128, 1], strides = [1, 1]} : vector<128x128xf32> to vector<128x1xf32>
      %462 = arith.addf %451, %460 : vector<128x1xf32>
      %463 = arith.addf %452, %461 : vector<128x1xf32>
      %cst_195 = arith.constant 0.000000e+00 : f32
      %464 = vector.broadcast %cst_195 : f32 to vector<128x1xf32>
      %465 = arith.cmpf ogt, %463, %464 : vector<128x1xf32>
      %466 = arith.mulf %460, %462 : vector<128x1xf32>
      %467 = arith.divf %466, %463 : vector<128x1xf32>
      %cst_196 = arith.constant 0.000000e+00 : f32
      %468 = vector.broadcast %cst_196 : f32 to vector<128x1xf32>
      %469 = arith.select %465, %467, %468 : vector<128x1xi1>, vector<128x1xf32>
      %470 = arith.addf %459, %469 : vector<128x1xf32>
      %471 = vector.extract_strided_slice %410 {offsets = [0, 5], sizes = [128, 1], strides = [1, 1]} : vector<128x128xf32> to vector<128x1xf32>
      %472 = vector.extract_strided_slice %411 {offsets = [0, 5], sizes = [128, 1], strides = [1, 1]} : vector<128x128xf32> to vector<128x1xf32>
      %473 = arith.addf %462, %471 : vector<128x1xf32>
      %474 = arith.addf %463, %472 : vector<128x1xf32>
      %cst_197 = arith.constant 0.000000e+00 : f32
      %475 = vector.broadcast %cst_197 : f32 to vector<128x1xf32>
      %476 = arith.cmpf ogt, %474, %475 : vector<128x1xf32>
      %477 = arith.mulf %471, %473 : vector<128x1xf32>
      %478 = arith.divf %477, %474 : vector<128x1xf32>
      %cst_198 = arith.constant 0.000000e+00 : f32
      %479 = vector.broadcast %cst_198 : f32 to vector<128x1xf32>
      %480 = arith.select %476, %478, %479 : vector<128x1xi1>, vector<128x1xf32>
      %481 = arith.addf %470, %480 : vector<128x1xf32>
      %482 = vector.extract_strided_slice %410 {offsets = [0, 6], sizes = [128, 1], strides = [1, 1]} : vector<128x128xf32> to vector<128x1xf32>
      %483 = vector.extract_strided_slice %411 {offsets = [0, 6], sizes = [128, 1], strides = [1, 1]} : vector<128x128xf32> to vector<128x1xf32>
      %484 = arith.addf %473, %482 : vector<128x1xf32>
      %485 = arith.addf %474, %483 : vector<128x1xf32>
      %cst_199 = arith.constant 0.000000e+00 : f32
      %486 = vector.broadcast %cst_199 : f32 to vector<128x1xf32>
      %487 = arith.cmpf ogt, %485, %486 : vector<128x1xf32>
      %488 = arith.mulf %482, %484 : vector<128x1xf32>
      %489 = arith.divf %488, %485 : vector<128x1xf32>
      %cst_200 = arith.constant 0.000000e+00 : f32
      %490 = vector.broadcast %cst_200 : f32 to vector<128x1xf32>
      %491 = arith.select %487, %489, %490 : vector<128x1xi1>, vector<128x1xf32>
      %492 = arith.addf %481, %491 : vector<128x1xf32>
      %493 = vector.extract_strided_slice %410 {offsets = [0, 7], sizes = [128, 1], strides = [1, 1]} : vector<128x128xf32> to vector<128x1xf32>
      %494 = vector.extract_strided_slice %411 {offsets = [0, 7], sizes = [128, 1], strides = [1, 1]} : vector<128x128xf32> to vector<128x1xf32>
      %495 = arith.addf %484, %493 : vector<128x1xf32>
      %496 = arith.addf %485, %494 : vector<128x1xf32>
      %cst_201 = arith.constant 0.000000e+00 : f32
      %497 = vector.broadcast %cst_201 : f32 to vector<128x1xf32>
      %498 = arith.cmpf ogt, %496, %497 : vector<128x1xf32>
      %499 = arith.mulf %493, %495 : vector<128x1xf32>
      %500 = arith.divf %499, %496 : vector<128x1xf32>
      %cst_202 = arith.constant 0.000000e+00 : f32
      %501 = vector.broadcast %cst_202 : f32 to vector<128x1xf32>
      %502 = arith.select %498, %500, %501 : vector<128x1xi1>, vector<128x1xf32>
      %503 = arith.addf %492, %502 : vector<128x1xf32>
      %504 = vector.extract_strided_slice %410 {offsets = [0, 8], sizes = [128, 1], strides = [1, 1]} : vector<128x128xf32> to vector<128x1xf32>
      %505 = vector.extract_strided_slice %411 {offsets = [0, 8], sizes = [128, 1], strides = [1, 1]} : vector<128x128xf32> to vector<128x1xf32>
      %506 = arith.addf %495, %504 : vector<128x1xf32>
      %507 = arith.addf %496, %505 : vector<128x1xf32>
      %cst_203 = arith.constant 0.000000e+00 : f32
      %508 = vector.broadcast %cst_203 : f32 to vector<128x1xf32>
      %509 = arith.cmpf ogt, %507, %508 : vector<128x1xf32>
      %510 = arith.mulf %504, %506 : vector<128x1xf32>
      %511 = arith.divf %510, %507 : vector<128x1xf32>
      %cst_204 = arith.constant 0.000000e+00 : f32
      %512 = vector.broadcast %cst_204 : f32 to vector<128x1xf32>
      %513 = arith.select %509, %511, %512 : vector<128x1xi1>, vector<128x1xf32>
      %514 = arith.addf %503, %513 : vector<128x1xf32>
      %515 = vector.extract_strided_slice %410 {offsets = [0, 9], sizes = [128, 1], strides = [1, 1]} : vector<128x128xf32> to vector<128x1xf32>
      %516 = vector.extract_strided_slice %411 {offsets = [0, 9], sizes = [128, 1], strides = [1, 1]} : vector<128x128xf32> to vector<128x1xf32>
      %517 = arith.addf %506, %515 : vector<128x1xf32>
      %518 = arith.addf %507, %516 : vector<128x1xf32>
      %cst_205 = arith.constant 0.000000e+00 : f32
      %519 = vector.broadcast %cst_205 : f32 to vector<128x1xf32>
      %520 = arith.cmpf ogt, %518, %519 : vector<128x1xf32>
      %521 = arith.mulf %515, %517 : vector<128x1xf32>
      %522 = arith.divf %521, %518 : vector<128x1xf32>
      %cst_206 = arith.constant 0.000000e+00 : f32
      %523 = vector.broadcast %cst_206 : f32 to vector<128x1xf32>
      %524 = arith.select %520, %522, %523 : vector<128x1xi1>, vector<128x1xf32>
      %525 = arith.addf %514, %524 : vector<128x1xf32>
      %526 = vector.extract_strided_slice %410 {offsets = [0, 10], sizes = [128, 1], strides = [1, 1]} : vector<128x128xf32> to vector<128x1xf32>
      %527 = vector.extract_strided_slice %411 {offsets = [0, 10], sizes = [128, 1], strides = [1, 1]} : vector<128x128xf32> to vector<128x1xf32>
      %528 = arith.addf %517, %526 : vector<128x1xf32>
      %529 = arith.addf %518, %527 : vector<128x1xf32>
      %cst_207 = arith.constant 0.000000e+00 : f32
      %530 = vector.broadcast %cst_207 : f32 to vector<128x1xf32>
      %531 = arith.cmpf ogt, %529, %530 : vector<128x1xf32>
      %532 = arith.mulf %526, %528 : vector<128x1xf32>
      %533 = arith.divf %532, %529 : vector<128x1xf32>
      %cst_208 = arith.constant 0.000000e+00 : f32
      %534 = vector.broadcast %cst_208 : f32 to vector<128x1xf32>
      %535 = arith.select %531, %533, %534 : vector<128x1xi1>, vector<128x1xf32>
      %536 = arith.addf %525, %535 : vector<128x1xf32>
      %cst_209 = arith.constant 0.000000e+00 : f32
      %537 = vector.broadcast %cst_209 : f32 to vector<128x1xf32>
      %538 = arith.cmpf ogt, %412, %537 : vector<128x1xf32>
      %c8_i32_210 = arith.constant 8 : i32
      %539 = vector.broadcast %c8_i32_210 : i32 to vector<128x1xi32>
      %540 = arith.cmpi slt, %13, %539 : vector<128x1xi32>
      %541 = arith.andi %538, %540 : vector<128x1xi1>
      %cst_211 = arith.constant 1.000000e+00 : f32
      %542 = vector.broadcast %cst_211 : f32 to vector<128x1xf32>
      %543 = arith.maximumf %412, %542 : vector<128x1xf32>
      %544 = arith.divf %536, %543 : vector<128x1xf32>
      %cst_212 = arith.constant 0.000000e+00 : f32
      %545 = vector.broadcast %cst_212 : f32 to vector<128x1xf32>
      %546 = arith.select %541, %544, %545 : vector<128x1xi1>, vector<128x1xf32>
      %547 = vector.shape_cast %546 : vector<128x1xf32> to vector<1x128x1xf32>
      %cst_213 = arith.constant dense<0.000000e+00> : vector<1xf32>
      %548 = vector.multi_reduction <add>, %547, %cst_213 [1, 2] : vector<1x128x1xf32> to vector<1xf32>
      %549 = vector.shape_cast %548 : vector<1xf32> to vector<1x1x1xf32>
      %550 = vector.extract %549[0, 0, 0] : f32 from vector<1x1x1xf32>
      %551 = arith.extui %541 : vector<128x1xi1> to vector<128x1xi32>
      %552 = arith.sitofp %551 : vector<128x1xi32> to vector<128x1xf32>
      %553 = vector.shape_cast %552 : vector<128x1xf32> to vector<1x128x1xf32>
      %cst_214 = arith.constant dense<0.000000e+00> : vector<1xf32>
      %554 = vector.multi_reduction <add>, %553, %cst_214 [1, 2] : vector<1x128x1xf32> to vector<1xf32>
      %555 = vector.shape_cast %554 : vector<1xf32> to vector<1x1x1xf32>
      %556 = vector.extract %555[0, 0, 0] : f32 from vector<1x1x1xf32>
      %c0_i32_215 = arith.constant 0 : i32
      %557 = vector.broadcast %c0_i32_215 : i32 to vector<1x128xi32>
      %558 = arith.cmpi eq, %43, %557 : vector<1x128xi32>
      %cst_216 = arith.constant 0.000000e+00 : f32
      %559 = vector.broadcast %550 : f32 to vector<1x128xf32>
      %560 = vector.broadcast %cst_216 : f32 to vector<1x128xf32>
      %561 = arith.select %558, %559, %560 : vector<1x128xi1>, vector<1x128xf32>
      %c1_i32_217 = arith.constant 1 : i32
      %562 = vector.broadcast %c1_i32_217 : i32 to vector<1x128xi32>
      %563 = arith.cmpi eq, %43, %562 : vector<1x128xi32>
      %cst_218 = arith.constant 0.000000e+00 : f32
      %564 = vector.broadcast %556 : f32 to vector<1x128xf32>
      %565 = vector.broadcast %cst_218 : f32 to vector<1x128xf32>
      %566 = arith.select %563, %564, %565 : vector<1x128xi1>, vector<1x128xf32>
      %567 = arith.addf %561, %566 : vector<1x128xf32>
      %c0_219 = arith.constant 0 : index
      %c0_220 = arith.constant 0 : index
      %568 = vector.load %arg6[%c0_219, %c0_220] : memref<1x128xf32, #tpu.memory_space<vmem>>, vector<1x128xf32>
      tpu.vector_store %arg6[%c0_219, %c0_220], %567 {strides = array<i32>} : memref<1x128xf32, #tpu.memory_space<vmem>>, vector<1x128xf32>,
    } else {
    }
    return
  }
  func.func @transform_0(%arg0: i32, %arg1: i32) -> (i32, i32) {
    %c0_i32 = arith.constant 0 : i32
    %c0_i32_0 = arith.constant 0 : i32
    return %arg0, %c0_i32 : i32, i32
  }
  func.func @transform_1(%arg0: i32, %arg1: i32) -> (i32, i32) {
    %c0_i32 = arith.constant 0 : i32
    %c0_i32_0 = arith.constant 0 : i32
    return %c0_i32, %arg1 : i32, i32
  }
  func.func @transform_2(%arg0: i32, %arg1: i32) -> (i32, i32) {
    %c0_i32 = arith.constant 0 : i32
    %c0_i32_0 = arith.constant 0 : i32
    return %arg0, %c0_i32 : i32, i32
  }
  func.func @transform_3(%arg0: i32, %arg1: i32) -> (i32, i32) {
    %c0_i32 = arith.constant 0 : i32
    %c0_i32_0 = arith.constant 0 : i32
    return %c0_i32, %arg1 : i32, i32
  }
  func.func @transform_4(%arg0: i32, %arg1: i32) -> (i32, i32) {
    %c0_i32 = arith.constant 0 : i32
    %c0_i32_0 = arith.constant 0 : i32
    return %arg0, %c0_i32 : i32, i32
  }
}

</mosaic_0001>

<bundles_post_ra>
// kernel: tpu_custom_call.1
= control target key start
LH: loop header
LB: loop body
LE: loop exit
PB: predicated region body
PF: predicated region fallthrough
CT: control target
= control target key end

     0   :  { %vm91_vm0 = vcmask 261120   ;;  %v8560_v3 = vmov 0   ;;  %s9148_s0 = inlined_call_operand.vmem [shape: f32[128,32], index: 0, kind: input, shape index: {}]   ;;  %s9149_s1 = inlined_call_operand.vmem [shape: f32[32,128], index: 1, kind: input, shape index: {}]   ;;  %s9150_s2 = inlined_call_operand.vmem [shape: s32[128,1], index: 2, kind: input, shape index: {}]   ;;  %s9151_s3 = inlined_call_operand.vmem [shape: s32[1,128], index: 3, kind: input, shape index: {}]   ;;  %s9152_s4 = inlined_call_operand.hbm [shape: f32[1,128], index: 4, kind: output, shape index: {}]  }
   0x1   :  { %v90_v0 = vld [vmem:[%s9149_s1 + $0x18] sm:$0xff]  ;;  %v89_v1 = vld [vmem:[%s9149_s1 + $0x10] sm:$0xff]  ;;  %v71_v2 = vld [vmem:[%s9148_s0] sm:$0xff]  ;;  %8511 = vset.pattern.permute.xlu0 %v8560_v3 }
   0x2   :  { %8444 = vmatprep.subr.mxu0 %v90_v0  ;;  %v88_v4 = vld [vmem:[%s9149_s1 + $0x8] sm:$0xff]  ;;  %8452 = vmatprep.mubr.msk.f32.mxu0 %vm91_vm0, %v71_v2  ;;  %v392_v5 = vld [vmem:[%s9150_s2] sm:$0xff] }
   0x3   :  { %8445 = vmatpush3.msra.mxu0 %v90_v0 }
   0x4   :  { %9 = vsyncpa [#allocation6], 0  ;;  %8446 = vmatprep.subr.mxu0 %v89_v1  ;;  %410 = vperm.xlu0 %8511, %v392_v5   ;;  %v87_v6 = vld [vmem:[%s9149_s1] sm:$0xff]  ;;  %v72_v7 = vld [vmem:[%s9148_s0 + $0x8] sm:$0xff]  ;;  %v318_v8 = vlaneseq  ;;  %v8561_v37 = vmov 0.0   ;;  %s8562_s30 = smov 126  }
   0x5   :  { %8447 = vmatpush3.msra.mxu0 %v89_v1  ;;  %8512 = vset.pattern.permute.xlu1 %v8560_v3  ;;  %v8647_v17 = vld [vmem:[%s9151_s3] ss:$0 sm:$0xff]  ;;  %s8563_s5 = smov 127   ;;  %s8564_s6 = smov 125  }
   0x6   :  { %8448 = vmatprep.subr.mxu0 %v88_v4  ;;  %8476 = vmatprep.subr.mxu1 %v90_v0  ;;  %v8631_v9 = vshrl.u32 %v318_v8, 7  ;;  %v8633_v10 = vand.u32 127, %v318_v8  ;;  %s8565_s7 = smov 124   ;;  %s8566_s8 = smov 123  }
   0x7   :  { %8449 = vmatpush3.msra.mxu0 %v88_v4  ;;  %8480 = vmatpush3.msra.mxu1 %v90_v0  ;;  %s8567_s9 = smov 122   ;;  %s8568_s10 = smov 121  }
   0x8   :  { %8450 = vmatprep.subr.mxu0 %v87_v6  ;;  %8477 = vmatprep.subr.mxu1 %v89_v1  ;;  %vm357_vm1 = vcmp.ne.s32.totalorder %v8631_v9, %v8633_v10  ;;  %vm373_vm2 = vcmp.lt.s32.totalorder %v8633_v10, 8  ;;  %vm9153_vm6 = vcmp.eq.s32.totalorder %v8633_v10, 1  ;;  %vm750_vm7 = vcmp.eq.s32.totalorder %v8633_v10, 0  ;;  %s8569_s11 = smov 120   ;;  %s8570_s12 = smov 119  }
   0x9   :  { %8451 = vmatpush3.msra.mxu0 %v87_v6  ;;  %8481 = vmatpush3.msra.mxu1 %v89_v1  ;;  %vm8640_vm3 = vmand %vm357_vm1, %vm373_vm2  ;;  %vm1300_vm8 = vcmp.eq.s32.totalorder %v8633_v10, 2  ;;  %vm1575_vm9 = vcmp.eq.s32.totalorder %v8633_v10, 3  ;;  %vm1850_vm10 = vcmp.eq.s32.totalorder %v8633_v10, 4  ;;  %vm2125_vm11 = vcmp.eq.s32.totalorder %v8633_v10, 5  ;;  %s8571_s13 = smov 118   ;;  %s8572_s14 = smov 1  }
   0xa   :  { %8453 = vmatmul.mubr.msk.f32.vlgmr.msra.gmra.mxu0 %vm91_vm0, %v72_v7  ;;  %8478 = vmatprep.subr.mxu1 %v88_v4  ;;  %vm2400_vm12 = vcmp.eq.s32.totalorder %v8633_v10, 6  ;;  %vm2675_vm13 = vcmp.eq.s32.totalorder %v8633_v10, 7  ;;  %vm2950_vm14 = vcmp.eq.s32.totalorder %v8633_v10, 8  ;;  %vm3225_vm15 = vcmp.eq.s32.totalorder %v8633_v10, 9  ;;  %s8573_s15 = smov 2   ;;  %s8574_s16 = smov 4  }
   0xb   :  { %8482 = vmatpush3.msra.mxu1 %v88_v4  ;;  %vm3500_vm1 = vcmp.eq.s32.totalorder %v8633_v10, 10  ;;  %s8575_s17 = smov 6   ;;  %s8576_s18 = smov 7  }
   0xc   :  { %8479 = vmatprep.subr.mxu1 %v87_v6  ;;  %s8577_s19 = smov 3   ;;  %s8578_s20 = smov 8  }
   0xd   :  { %8483 = vmatpush3.msra.mxu1 %v87_v6  ;;  %s8579_s21 = smov 9   ;;  %s8580_s22 = smov 5  }
   0xe   :  { %s8581_s23 = smov 10   ;;  %s8582_s1 = smov [#allocation5]  }
   0xf   :  { %s8238_s29 = sshll.u32 %s8582_s1, 4  ;;  %s8239_s29 = int_to_ptr.vmem [resolvable:$true] %s8238_s29 }
  0x10   :  { %p8543_p1 = scmp.lt.s32.totalorder %s8239_s29, %s8239_s29 }
  0x7f   :  { %v411_v18 = vpop.permute.xlu0 %410 }
  0x80   :  { %vm461_vm4 = vcmp.eq.s32.totalorder %v411_v18, %v8647_v17 }
  0x81   :  { %vm477_vm5 = vmand %vm461_vm4, %vm8640_vm3 }
  0x82   :  { %v8663_v38 = vsel %vm477_vm5, 1.0, %v8561_v37 }
  0xca   :  { %v8454_v11 = vpop.f32.mrf.mxu0 }
  0xcc   :  { %v206_v12 = vpop.f32.mrf.mxu0 }
  0xcd   :  { %v285_v13 = vmul.f32 2.0, %v206_v12 }
  0xcf   :  { %v301_v14 = vsub.f32 2.0, %v285_v13 }
  0xd1   :  { %v590_v16 = vmul.f32 2.5, %v301_v14 }
  0xd3   :  { %v8651_v19 = vsel %vm8640_vm3, %v590_v16, 1e+09  ;;  %vm54_vm3 = vcmask 7168  }
  0xd4   :  { %v622_v20 = vand.u32 2147483647, %v8651_v19  ;;  %v8263_v21 = vadd.f32 -1.0, %v8651_v19  ;;  %v8279_v22 = vadd.f32 -2.0, %v8651_v19  ;;  %v8295_v23 = vadd.f32 -3.0, %v8651_v19  ;;  %55 = vst.msk [vmem:[#allocation4] sm:$0xff] %vm54_vm3, %v8561_v37 }
  0xd5   :  { %v8311_v24 = vadd.f32 -4.0, %v8651_v19  ;;  %v8327_v29 = vadd.f32 -5.0, %v8651_v19  ;;  %v8359_v39 = vadd.f32 -7.0, %v8651_v19  ;;  %v8391_v44 = vadd.f32 -9.0, %v8651_v19  ;;  %56 = vst.msk [vmem:[#allocation4 + $0x8] sm:$0xff] %vm54_vm3, %v8561_v37  ;;  %57 = vst.msk [vmem:[#allocation4 + $0x10] sm:$0xff] %vm54_vm3, %v8561_v37 }
  0xd6   :  { %v638_v25 = vsub.f32 1.0, %v622_v20  ;;  %v897_v26 = vand.u32 2147483647, %v8263_v21  ;;  %v1172_v27 = vand.u32 2147483647, %v8279_v22  ;;  %v8343_v49 = vadd.f32 -6.0, %v8651_v19 }
  0xd7   :  { %v1447_v28 = vand.u32 2147483647, %v8295_v23  ;;  %v1722_v33 = vand.u32 2147483647, %v8311_v24  ;;  %v1997_v43 = vand.u32 2147483647, %v8327_v29 }
  0xd8   :  { %v654_v30 = vmax.f32 %v638_v25, 0.0  ;;  %v913_v31 = vsub.f32 1.0, %v897_v26  ;;  %v1188_v32 = vsub.f32 1.0, %v1172_v27  ;;  %v2547_v48 = vand.u32 2147483647, %v8359_v39  ;;  %58 = vst.msk [vmem:[#allocation4 + $0x18] sm:$0xff] %vm54_vm3, %v8561_v37 }
  0xd9   :  { %v1463_v34 = vsub.f32 1.0, %v1447_v28  ;;  %v1738_v42 = vsub.f32 1.0, %v1722_v33  ;;  %v2013_v47 = vsub.f32 1.0, %v1997_v43  ;;  %v3097_v53 = vand.u32 2147483647, %v8391_v44  ;;  %59 = vst.msk [vmem:[#allocation4 + $0x20] sm:$0xff] %vm54_vm3, %v8561_v37 }
  0xda   :  { %718 = vadd.xlane.f32.xlu0 %v654_v30  ;;  %v929_v35 = vmax.f32 %v913_v31, 0.0  ;;  %v1204_v36 = vmax.f32 %v1188_v32, 0.0  ;;  %v2563_v52 = vsub.f32 1.0, %v2547_v48  ;;  %v2272_v54 = vand.u32 2147483647, %v8343_v49  ;;  %60 = vst.msk [vmem:[#allocation4 + $0x28] sm:$0xff] %vm54_vm3, %v8561_v37 }
  0xdb   :  { %v1479_v41 = vmax.f32 %v1463_v34, 0.0  ;;  %v1754_v46 = vmax.f32 %v1738_v42, 0.0  ;;  %v2029_v51 = vmax.f32 %v2013_v47, 0.0  ;;  %v3113_v57 = vsub.f32 1.0, %v3097_v53  ;;  %61 = vst.msk [vmem:[#allocation4 + $0x30] sm:$0xff] %vm54_vm3, %v8561_v37  ;;  %62 = vst.msk [vmem:[#allocation4 + $0x38] sm:$0xff] %vm54_vm3, %v8561_v37 }
  0xdc   :  { %993 = vadd.xlane.f32.xlu1 %v929_v35  ;;  %v1220_v40 = vmul.f32 %v1204_v36, %v8663_v38  ;;  %v2579_v56 = vmax.f32 %v2563_v52, 0.0  ;;  %v2288_v58 = vsub.f32 1.0, %v2272_v54  ;;  %v8375_v62 = vadd.f32 -8.0, %v8651_v19  ;;  %63 = vst.msk [vmem:[#allocation4 + $0x40] sm:$0xff] %vm54_vm3, %v8561_v37  ;;  %64 = vst.msk [vmem:[#allocation4 + $0x48] sm:$0xff] %vm54_vm3, %v8561_v37 }
  0xdd   :  { %v1495_v45 = vmul.f32 %v1479_v41, %v8663_v38  ;;  %v1770_v50 = vmul.f32 %v1754_v46, %v8663_v38  ;;  %v2045_v55 = vmul.f32 %v2029_v51, %v8663_v38  ;;  %v3129_v60 = vmax.f32 %v3113_v57, 0.0  ;;  %65 = vst.msk [vmem:[#allocation4 + $0x50] sm:$0xff] %vm54_vm3, %v8561_v37  ;;  %66 = vst.msk [vmem:[#allocation4 + $0x58] sm:$0xff] %vm54_vm3, %v8561_v37 }
  0xde   :  { %1236 = vadd.xlane.f32.xlu0 %v1220_v40  ;;  %v2595_v59 = vmul.f32 %v2579_v56, %v8663_v38  ;;  %v2304_v61 = vmax.f32 %v2288_v58, 0.0  ;;  %v670_v0 = vmul.f32 %v654_v30, %v8663_v38  ;;  %v2822_v1 = vand.u32 2147483647, %v8375_v62  ;;  %67 = vst.msk [vmem:[#allocation4 + $0x60] sm:$0xff] %vm54_vm3, %v8561_v37  ;;  %68 = vst.msk [vmem:[#allocation4 + $0x68] sm:$0xff] %vm54_vm3, %v8561_v37 }
  0xdf   :  { %v3145_v63 = vmul.f32 %v3129_v60, %v8663_v38  ;;  %v8407_v4 = vadd.f32 -10.0, %v8651_v19  ;;  %v945_v5 = vmul.f32 %v929_v35, %v8663_v38  ;;  %69 = vst.msk [vmem:[#allocation4 + $0x70] sm:$0xff] %vm54_vm3, %v8561_v37  ;;  %70 = vst.msk [vmem:[#allocation4 + $0x78] sm:$0xff] %vm54_vm3, %v8561_v37 }
  0xe0   :  { %1268 = vadd.xlane.f32.xlu1 %v1204_v36  ;;  %v2838_v2 = vsub.f32 1.0, %v2822_v1  ;;  %v2320_v11 = vmul.f32 %v2304_v61, %v8663_v38 }
  0xe1   :  { %v3372_v6 = vand.u32 2147483647, %v8407_v4 }
  0xe2   :  { %1511 = vadd.xlane.f32.xlu0 %v1495_v45  ;;  %v2854_v3 = vmax.f32 %v2838_v2, 0.0 }
  0xe3   :  { %v3388_v7 = vsub.f32 1.0, %v3372_v6 }
  0xe4   :  { %1543 = vadd.xlane.f32.xlu1 %v1479_v41  ;;  %v2870_v12 = vmul.f32 %v2854_v3, %v8663_v38 }
  0xe5   :  { %v3404_v8 = vmax.f32 %v3388_v7, 0.0 }
  0xe6   :  { %1786 = vadd.xlane.f32.xlu0 %v1770_v50 }
  0xe7   :  { %v3420_v13 = vmul.f32 %v3404_v8, %v8663_v38 }
  0xe8   :  { %1818 = vadd.xlane.f32.xlu1 %v1754_v46 }
  0xea   :  { %2061 = vadd.xlane.f32.xlu0 %v2045_v55 }
  0xec   :  { %2093 = vadd.xlane.f32.xlu1 %v2029_v51 }
  0xee   :  { %2611 = vadd.xlane.f32.xlu0 %v2595_v59 }
  0xf0   :  { %2368 = vadd.xlane.f32.xlu1 %v2304_v61 }
  0xf2   :  { %3161 = vadd.xlane.f32.xlu0 %v3145_v63 }
  0xf4   :  { %686 = vadd.xlane.f32.xlu1 %v670_v0 }
  0xf8   :  { %2643 = vadd.xlane.f32.xlu1 %v2579_v56 }
  0xfc   :  { %2918 = vadd.xlane.f32.xlu1 %v2854_v3 }
 0x100   :  { %961 = vadd.xlane.f32.xlu1 %v945_v5 }
 0x104   :  { %3193 = vadd.xlane.f32.xlu1 %v3129_v60 }
 0x108   :  { %3468 = vadd.xlane.f32.xlu1 %v3404_v8 }
 0x10c   :  { %2336 = vadd.xlane.f32.xlu1 %v2320_v11 }
 0x110   :  { %2886 = vadd.xlane.f32.xlu1 %v2870_v12 }
 0x114   :  { %3436 = vadd.xlane.f32.xlu1 %v3420_v13 }
 0x163   :  { %v719_v19 = vpop.xlane.xlu0 %718 }
 0x164   :  { %v833_v25 = vsel %vm750_vm7, %v719_v19, 0.0 }
 0x165   :  { %v994_v14 = vpop.xlane.xlu1 %993 }
 0x166   :  { %v1108_v24 = vsel %vm9153_vm6, %v994_v14, 0.0 }
 0x167   :  { %v1237_v22 = vpop.xlane.xlu0 %1236  ;;  %v1124_v27 = vadd.f32 %v1108_v24, %v833_v25 }
 0x168   :  { %v1319_v48 = vsel %vm1300_vm8, %v1237_v22, 0.0 }
 0x169   :  { %v1269_v15 = vpop.xlane.xlu1 %1268 }
 0x16a   :  { %v1383_v26 = vsel %vm1300_vm8, %v1269_v15, 0.0 }
 0x16b   :  { %v1512_v28 = vpop.xlane.xlu0 %1511  ;;  %v1399_v31 = vadd.f32 %v1383_v26, %v1124_v27 }
 0x16c   :  { %v1594_v54 = vsel %vm1575_vm9, %v1512_v28, 0.0 }
 0x16d   :  { %v1544_v16 = vpop.xlane.xlu1 %1543 }
 0x16e   :  { %v1658_v30 = vsel %vm1575_vm9, %v1544_v16, 0.0 }
 0x16f   :  { %v1674_v33 = vadd.f32 %v1658_v30, %v1399_v31  ;;  %v1787_v36 = vpop.xlane.xlu0 %1786 }
 0x170   :  { %v1869_v58 = vsel %vm1850_vm10, %v1787_v36, 0.0 }
 0x171   :  { %v1819_v18 = vpop.xlane.xlu1 %1818 }
 0x172   :  { %v1933_v32 = vsel %vm1850_vm10, %v1819_v18, 0.0 }
 0x173   :  { %v1949_v39 = vadd.f32 %v1933_v32, %v1674_v33  ;;  %v2062_v50 = vpop.xlane.xlu0 %2061 }
 0x174   :  { %v2144_v1 = vsel %vm2125_vm11, %v2062_v50, 0.0 }
 0x175   :  { %v2094_v20 = vpop.xlane.xlu1 %2093 }
 0x176   :  { %v2208_v35 = vsel %vm2125_vm11, %v2094_v20, 0.0 }
 0x177   :  { %v2224_v41 = vadd.f32 %v2208_v35, %v1949_v39  ;;  %v2612_v63 = vpop.xlane.xlu0 %2611 }
 0x178   :  { %v2694_v6 = vsel %vm2675_vm13, %v2612_v63, 0.0 }
 0x179   :  { %v2369_v21 = vpop.xlane.xlu1 %2368 }
 0x17a   :  { %v2483_v40 = vsel %vm2400_vm12, %v2369_v21, 0.0 }
 0x17b   :  { %v2499_v46 = vadd.f32 %v2483_v40, %v2224_v41  ;;  %v3162_v7 = vpop.xlane.xlu0 %3161 }
 0x17c   :  { %v3244_v14 = vsel %vm3225_vm15, %v3162_v7, 0.0 }
 0x17d   :  { %v687_v23 = vpop.xlane.xlu1 %686 }
 0x17e   :  { %v769_v43 = vsel %vm750_vm7, %v687_v23, 0.0 }
 0x181   :  { %v2644_v29 = vpop.xlane.xlu1 %2643 }
 0x182   :  { %v2758_v44 = vsel %vm2675_vm13, %v2644_v29, 0.0 }
 0x183   :  { %v2774_v51 = vadd.f32 %v2758_v44, %v2499_v46 }
 0x185   :  { %v2919_v34 = vpop.xlane.xlu1 %2918 }
 0x186   :  { %v3033_v49 = vsel %vm2950_vm14, %v2919_v34, 0.0 }
 0x187   :  { %v3049_v56 = vadd.f32 %v3033_v49, %v2774_v51 }
 0x189   :  { %v962_v42 = vpop.xlane.xlu1 %961 }
 0x18a   :  { %v1044_v45 = vsel %vm9153_vm6, %v962_v42, 0.0 }
 0x18b   :  { %v1060_v47 = vadd.f32 %v1044_v45, %v769_v43 }
 0x18d   :  { %v1335_v52 = vadd.f32 %v1319_v48, %v1060_v47  ;;  %v3194_v53 = vpop.xlane.xlu1 %3193 }
 0x18e   :  { %v3308_v55 = vsel %vm3225_vm15, %v3194_v53, 0.0 }
 0x18f   :  { %v1610_v57 = vadd.f32 %v1594_v54, %v1335_v52  ;;  %v3324_v59 = vadd.f32 %v3308_v55, %v3049_v56 }
 0x191   :  { %v3469_v60 = vpop.xlane.xlu1 %3468  ;;  %v1885_v61 = vadd.f32 %v1869_v58, %v1610_v57 }
 0x192   :  { %v3583_v62 = vsel %vm3500_vm1, %v3469_v60, 0.0 }
 0x193   :  { %v8724_v0 = vadd.f32 %v3583_v62, %v3324_v59  ;;  %v2160_v2 = vadd.f32 %v2144_v1, %v1885_v61 }
 0x195   :  { %4322 = vrot.lane.b32.xlu1 %v8724_v0, %s8562_s30  ;;  %3906 = vrot.lane.b32.xlu0 %v8724_v0, %s8563_s5  ;;  %v2337_v3 = vpop.xlane.xlu1 %2336  ;;  %vm3714_vm5 = vcmp.gt.f32.partialorder %v8724_v0, 0.0 }
 0x196   :  { %v2419_v4 = vsel %vm2400_vm12, %v2337_v3, 0.0 }
 0x197   :  { %v2435_v5 = vadd.f32 %v2419_v4, %v2160_v2 }
 0x199   :  { %4738 = vrot.lane.b32.xlu1 %v8724_v0, %s8564_s6  ;;  %5154 = vrot.lane.b32.xlu0 %v8724_v0, %s8565_s7  ;;  %v2710_v8 = vadd.f32 %v2694_v6, %v2435_v5  ;;  %v2887_v11 = vpop.xlane.xlu1 %2886 }
 0x19a   :  { %v2969_v12 = vsel %vm2950_vm14, %v2887_v11, 0.0 }
 0x19b   :  { %v2985_v13 = vadd.f32 %v2969_v12, %v2710_v8 }
 0x19d   :  { %v3260_v15 = vadd.f32 %v3244_v14, %v2985_v13  ;;  %5570 = vrot.lane.b32.xlu1 %v8724_v0, %s8566_s8  ;;  %5986 = vrot.lane.b32.xlu0 %v8724_v0, %s8567_s9  ;;  %v3437_v16 = vpop.xlane.xlu1 %3436 }
 0x19e   :  { %v3519_v18 = vsel %vm3500_vm1, %v3437_v16, 0.0 }
 0x19f   :  { %v8750_v19 = vadd.f32 %v3519_v18, %v3260_v15 }
 0x1a1   :  { %6402 = vrot.lane.b32.xlu0 %v8724_v0, %s8568_s10  ;;  %3826 = vrot.lane.b32.xlu1 %v8750_v19, %s8563_s5 }
 0x1a5   :  { %6818 = vrot.lane.b32.xlu0 %v8724_v0, %s8569_s11  ;;  %4258 = vrot.lane.b32.xlu1 %v8750_v19, %s8562_s30 }
 0x1a9   :  { %7234 = vrot.lane.b32.xlu0 %v8724_v0, %s8570_s12  ;;  %4674 = vrot.lane.b32.xlu1 %v8750_v19, %s8564_s6 }
 0x1ad   :  { %7650 = vrot.lane.b32.xlu0 %v8724_v0, %s8571_s13  ;;  %5090 = vrot.lane.b32.xlu1 %v8750_v19, %s8565_s7 }
 0x1b1   :  { %5922 = vrot.lane.b32.xlu0 %v8750_v19, %s8567_s9  ;;  %5506 = vrot.lane.b32.xlu1 %v8750_v19, %s8566_s8 }
 0x1b5   :  { %6754 = vrot.lane.b32.xlu0 %v8750_v19, %s8569_s11  ;;  %6338 = vrot.lane.b32.xlu1 %v8750_v19, %s8568_s10 }
 0x1b9   :  { %7586 = vrot.lane.b32.xlu0 %v8750_v19, %s8571_s13  ;;  %7170 = vrot.lane.b32.xlu1 %v8750_v19, %s8570_s12 }
 0x207   :  { %v3907_v20 = vpop.permute.xlu0 %3906  ;;  %v4323_v21 = vpop.permute.xlu1 %4322 }
 0x208   :  { %v8781_v22 = vadd.f32 %v3907_v20, %v8724_v0 }
 0x20a   :  { %v8784_v23 = vadd.f32 %v4323_v21, %v8781_v22  ;;  %4082 = vrot.lane.b32.xlu1 %v8781_v22, %s8572_s14  ;;  %vm3970_vm4 = vcmp.gt.f32.partialorder %v8781_v22, 0.0 }
 0x20b   :  { %v5155_v24 = vpop.permute.xlu0 %5154  ;;  %v4739_v25 = vpop.permute.xlu1 %4738 }
 0x20c   :  { %v8788_v26 = vadd.f32 %v4739_v25, %v8784_v23  ;;  %4498 = vrot.lane.b32.xlu0 %v8784_v23, %s8573_s15  ;;  %vm4386_vm8 = vcmp.gt.f32.partialorder %v8784_v23, 0.0 }
 0x20e   :  { %v8792_v27 = vadd.f32 %v5155_v24, %v8788_v26  ;;  %vm4802_vm9 = vcmp.gt.f32.partialorder %v8788_v26, 0.0 }
 0x20f   :  { %v5987_v28 = vpop.permute.xlu0 %5986  ;;  %v5571_v29 = vpop.permute.xlu1 %5570 }
 0x210   :  { %v8795_v30 = vadd.f32 %v5571_v29, %v8792_v27  ;;  %5330 = vrot.lane.b32.xlu0 %v8792_v27, %s8574_s16  ;;  %vm5218_vm10 = vcmp.gt.f32.partialorder %v8792_v27, 0.0 }
 0x212   :  { %v8800_v31 = vadd.f32 %v5987_v28, %v8795_v30  ;;  %vm5634_vm11 = vcmp.gt.f32.partialorder %v8795_v30, 0.0 }
 0x213   :  { %v6403_v32 = vpop.permute.xlu0 %6402  ;;  %v3827_v33 = vpop.permute.xlu1 %3826 }
 0x214   :  { %v3874_v34 = vadd.f32 %v3827_v33, %v8750_v19  ;;  %6162 = vrot.lane.b32.xlu0 %v8800_v31, %s8575_s17  ;;  %v8806_v35 = vadd.f32 %v6403_v32, %v8800_v31  ;;  %vm6050_vm12 = vcmp.gt.f32.partialorder %v8800_v31, 0.0 }
 0x216   :  { %4002 = vrot.lane.b32.xlu1 %v3874_v34, %s8572_s14  ;;  %vm6466_vm13 = vcmp.gt.f32.partialorder %v8806_v35, 0.0 }
 0x217   :  { %v6819_v36 = vpop.permute.xlu0 %6818  ;;  %v4259_v39 = vpop.permute.xlu1 %4258 }
 0x218   :  { %6578 = vrot.lane.b32.xlu0 %v8806_v35, %s8576_s18  ;;  %v8811_v40 = vadd.f32 %v6819_v36, %v8806_v35  ;;  %v4306_v43 = vadd.f32 %v4259_v39, %v3874_v34  ;;  %v320_v35 = vadd.s32 8, %v8631_v9 }
 0x21a   :  { %4914 = vrot.lane.b32.xlu1 %v8788_v26, %s8577_s19  ;;  %vm6882_vm14 = vcmp.gt.f32.partialorder %v8811_v40, 0.0 }
 0x21b   :  { %v7235_v41 = vpop.permute.xlu0 %7234  ;;  %v4675_v42 = vpop.permute.xlu1 %4674 }
 0x21c   :  { %6994 = vrot.lane.b32.xlu0 %v8811_v40, %s8578_s20  ;;  %v8816_v44 = vadd.f32 %v7235_v41, %v8811_v40  ;;  %v4722_v47 = vadd.f32 %v4675_v42, %v4306_v43 }
 0x21e   :  { %4418 = vrot.lane.b32.xlu1 %v4306_v43, %s8573_s15  ;;  %vm7298_vm15 = vcmp.gt.f32.partialorder %v8816_v44, 0.0 }
 0x21f   :  { %v7651_v45 = vpop.permute.xlu0 %7650  ;;  %v5091_v46 = vpop.permute.xlu1 %5090 }
 0x220   :  { %7410 = vrot.lane.b32.xlu0 %v8816_v44, %s8579_s21  ;;  %v8820_v48 = vadd.f32 %v7651_v45, %v8816_v44  ;;  %v5138_v49 = vadd.f32 %v5091_v46, %v4722_v47  ;;  %v321_v44 = vadd.s32 16, %v8631_v9 }
 0x222   :  { %5746 = vrot.lane.b32.xlu1 %v8795_v30, %s8580_s22  ;;  %vm7714_vm1 = vcmp.gt.f32.partialorder %v8820_v48, 0.0 }
 0x223   :  { %v5923_v50 = vpop.permute.xlu0 %5922  ;;  %v5507_v51 = vpop.permute.xlu1 %5506 }
 0x224   :  { %v5554_v52 = vadd.f32 %v5507_v51, %v5138_v49  ;;  %7826 = vrot.lane.b32.xlu0 %v8820_v48, %s8581_s23 }
 0x226   :  { %4834 = vrot.lane.b32.xlu1 %v4722_v47, %s8577_s19  ;;  %v5970_v53 = vadd.f32 %v5923_v50, %v5554_v52 }
 0x227   :  { %v6755_v54 = vpop.permute.xlu0 %6754  ;;  %v6339_v55 = vpop.permute.xlu1 %6338 }
 0x228   :  { %v6386_v56 = vadd.f32 %v6339_v55, %v5970_v53  ;;  %6082 = vrot.lane.b32.xlu0 %v5970_v53, %s8575_s17  ;;  %v397_v55 = vld [vmem:[%s9150_s2 + $0x28] sm:$0xff] }
 0x22a   :  { %5250 = vrot.lane.b32.xlu1 %v5138_v49, %s8574_s16  ;;  %v6802_v57 = vadd.f32 %v6755_v54, %v6386_v56 }
 0x22b   :  { %v7171_v58 = vpop.permute.xlu1 %7170  ;;  %v7587_v60 = vpop.permute.xlu0 %7586 }
 0x22c   :  { %v7218_v59 = vadd.f32 %v7171_v58, %v6802_v57  ;;  %6914 = vrot.lane.b32.xlu0 %v6802_v57, %s8578_s20 }
 0x22e   :  { %v7634_v61 = vadd.f32 %v7587_v60, %v7218_v59  ;;  %5666 = vrot.lane.b32.xlu1 %v5554_v52, %s8580_s22  ;;  %v80_v60 = vld [vmem:[%s9148_s0 + $0x48] sm:$0xff] }
 0x230   :  { %7746 = vrot.lane.b32.xlu0 %v7634_v61, %s8581_s23  ;;  %v73_v61 = vld [vmem:[%s9148_s0 + $0x10] sm:$0xff] }
 0x231   :  { %8455 = vmatprep.mubr.msk.f32.mxu0 %vm91_vm0, %v73_v61 }
 0x232   :  { %6498 = vrot.lane.b32.xlu1 %v6386_v56, %s8576_s18 }
 0x236   :  { %7330 = vrot.lane.b32.xlu1 %v7218_v59, %s8579_s21  ;;  %v79_v59 = vld [vmem:[%s9148_s0 + $0x40] sm:$0xff] }
 0x237   :  { %8464 = vmatprep.mubr.msk.f32.mxu1 %vm91_vm0, %v79_v59 }
 0x238   :  { %8465 = vmatmul.mubr.msk.f32.vlgmr.msra.gmra.mxu1 %vm91_vm0, %v80_v60 }
 0x25a   :  { %525 = vadd.xlane.f32.xlu1 %v8663_v38 }
 0x27c   :  { %v4083_v38 = vpop.permute.xlu1 %4082 }
 0x27d   :  { %8513 = vrcp.f32 %v4083_v38 }
 0x27e   :  { %v4499_v62 = vpop.permute.xlu0 %4498 }
 0x27f   :  { %8515 = vrcp.f32 %v4499_v62  ;;  %v399_v62 = vld [vmem:[%s9150_s2 + $0x38] sm:$0xff] }
 0x282   :  { %v5331_v63 = vpop.permute.xlu0 %5330 }
 0x286   :  { %v6163_v1 = vpop.permute.xlu0 %6162 }
 0x288   :  { %v4003_v2 = vpop.permute.xlu1 %4002 }
 0x289   :  { %v4050_v3 = vmul.f32 %v4003_v2, %v8750_v19 }
 0x28a   :  { %v8514_v4 = vpop.eup %8513  ;;  %v6579_v5 = vpop.permute.xlu0 %6578 }
 0x28b   :  { %v4131_v6 = vmul.f32 %v8514_v4, %v4050_v3  ;;  %v401_v4 = vld [vmem:[%s9150_s2 + $0x48] sm:$0xff] }
 0x28c   :  { %v4915_v7 = vpop.permute.xlu1 %4914  ;;  %v8516_v13 = vpop.eup %8515 }
 0x28d   :  { %8517 = vrcp.f32 %v4915_v7  ;;  %4178 = vrot.lane.b32.xlu0 %v4131_v6, %s8563_s5  ;;  %v82_v6 = vld [vmem:[%s9148_s0 + $0x58] sm:$0xff]  ;;  %s8542_s5 = scalar_lea.vmem %s8239_s29, 32 }
 0x28e   :  { %v6995_v8 = vpop.permute.xlu0 %6994  ;;  %8519 = vrcp.f32 %v5331_v63  ;;  %v81_v63 = vld [vmem:[%s9148_s0 + $0x50] sm:$0xff] }
 0x28f   :  { %8467 = vmatprep.mubr.msk.f32.mxu1 %vm91_vm0, %v81_v63 }
 0x290   :  { %v4419_v11 = vpop.permute.xlu1 %4418  ;;  %8468 = vmatmul.mubr.msk.f32.gmra.mxu1 %vm91_vm0, %v82_v6 }
 0x291   :  { %v4466_v12 = vmul.f32 %v4419_v11, %v8750_v19  ;;  %v403_v11 = vld [vmem:[%s9150_s2 + $0x58] sm:$0xff] }
 0x292   :  { %v7411_v14 = vpop.permute.xlu0 %7410 }
 0x293   :  { %v4547_v15 = vmul.f32 %v8516_v13, %v4466_v12  ;;  %v75_v12 = vld [vmem:[%s9148_s0 + $0x20] sm:$0xff] }
 0x294   :  { %v5747_v16 = vpop.permute.xlu1 %5746  ;;  %v83_v13 = vld [vmem:[%s9148_s0 + $0x60] sm:$0xff] }
 0x295   :  { %8521 = vrcp.f32 %v5747_v16  ;;  %4594 = vrot.lane.b32.xlu0 %v4547_v15, %s8562_s30  ;;  %v393_v15 = vld [vmem:[%s9150_s2 + $0x8] sm:$0xff]  ;;  %8470 = vmatprep.mubr.msk.f32.mxu1 %vm91_vm0, %v83_v13  ;;  %s8538_s30 = scalar_lea.vmem %s8239_s29, 16 }
 0x296   :  { %v7827_v18 = vpop.permute.xlu0 %7826  ;;  %v84_v16 = vld [vmem:[%s9148_s0 + $0x68] sm:$0xff]  ;;  %p8539_p0 = scmp.ne.s32.totalorder %s8239_s29, %s8538_s30  ;;  %p8544_p2 = scmp.lt.s32.totalorder %s8542_s5, %s8538_s30 }
 0x297   :  { %8523 = vrcp.f32 %v7827_v18  ;;  %v405_v18 = vld [vmem:[%s9150_s2 + $0x68] sm:$0xff]  ;;  %8471 = vmatmul.mubr.msk.f32.gmra.mxu1 %vm91_vm0, %v84_v16 }
 0x298   :  { %v4835_v20 = vpop.permute.xlu1 %4834  ;;  %8525 = vrcp.f32 %v6163_v1  ;;  %p8545_p3 = por %p8544_p2, %p8543_p1 }
 0x299   :  { %v4882_v21 = vmul.f32 %v4835_v20, %v8750_v19  ;;  %8527 = vrcp.f32 %v6579_v5  ;;  %v74_v5 = vld [vmem:[%s9148_s0 + $0x18] sm:$0xff]  ;;  %v77_v20 = vld [vmem:[%s9148_s0 + $0x30] sm:$0xff] }
 0x29a   :  { %v8518_v24 = vpop.eup %8517  ;;  %v6083_v25 = vpop.permute.xlu0 %6082  ;;  %8529 = vrcp.f32 %v6995_v8  ;;  %8456 = vmatmul.mubr.msk.f32.gmra.mxu0 %vm91_vm0, %v74_v5  ;;  %p8546_p4 = pnand %p8545_p3, %p8539_p0 }
 0x29b   :  { %v4963_v28 = vmul.f32 %v8518_v24, %v4882_v21  ;;  %v8520_v33 = vpop.eup %8519  ;;  %v6130_v45 = vmul.f32 %v6083_v25, %v8750_v19  ;;  %8531 = vrcp.f32 %v7411_v14  ;;  %v76_v14 = vld [vmem:[%s9148_s0 + $0x28] sm:$0xff]  ;;  %8458 = vmatprep.mubr.msk.f32.mxu0 %vm91_vm0, %v75_v12  ;;  %v85_v21 = vld [vmem:[%s9148_s0 + $0x70] sm:$0xff]  ;;  %v78_v24 = vld [vmem:[%s9148_s0 + $0x38] sm:$0xff] }
 0x29c   :  { %v5251_v29 = vpop.permute.xlu1 %5250  ;;  %v394_v25 = vld [vmem:[%s9150_s2 + $0x10] sm:$0xff]  ;;  %8473 = vmatprep.mubr.msk.f32.mxu1 %vm91_vm0, %v85_v21  ;;  %8533 = vrcp.f32 %v8724_v0 }
 0x29d   :  { %v5298_v32 = vmul.f32 %v5251_v29, %v8750_v19  ;;  %5010 = vrot.lane.b32.xlu0 %v4963_v28, %s8564_s6  ;;  %v86_v28 = vld [vmem:[%s9148_s0 + $0x78] sm:$0xff] }
 0x29e   :  { %v6915_v34 = vpop.permute.xlu0 %6914  ;;  %8459 = vmatmul.mubr.msk.f32.gmra.mxu0 %vm91_vm0, %v76_v14  ;;  %v407_v29 = vld [vmem:[%s9150_s2 + $0x78] sm:$0xff]  ;;  %8474 = vmatmul.mubr.msk.f32.gmra.mxu1 %vm91_vm0, %v86_v28  ;;  %v322_v28 = vadd.s32 24, %v8631_v9 }
 0x29f   :  { %v5379_v36 = vmul.f32 %v8520_v33, %v5298_v32  ;;  %v6962_v57 = vmul.f32 %v6915_v34, %v8750_v19  ;;  %8461 = vmatprep.mubr.msk.f32.mxu0 %vm91_vm0, %v77_v20  ;;  %v395_v32 = vld [vmem:[%s9150_s2 + $0x18] sm:$0xff]  ;;  %v396_v33 = vld [vmem:[%s9150_s2 + $0x20] sm:$0xff]  ;;  %v398_v34 = vld [vmem:[%s9150_s2 + $0x30] sm:$0xff] }
 0x2a0   :  { %v5667_v39 = vpop.permute.xlu1 %5666 }
 0x2a1   :  { %v5714_v41 = vmul.f32 %v5667_v39, %v8750_v19  ;;  %5426 = vrot.lane.b32.xlu0 %v5379_v36, %s8565_s7  ;;  %v400_v36 = vld [vmem:[%s9150_s2 + $0x40] sm:$0xff]  ;;  %v402_v39 = vld [vmem:[%s9150_s2 + $0x50] sm:$0xff] }
 0x2a2   :  { %v8522_v42 = vpop.eup %8521  ;;  %v7747_v43 = vpop.permute.xlu0 %7746  ;;  %8462 = vmatmul.mubr.msk.f32.gmra.mxu0 %vm91_vm0, %v78_v24  ;;  %v324_v24 = vadd.s32 40, %v8631_v9 }
 0x2a3   :  { %v5795_v46 = vmul.f32 %v8522_v42, %v5714_v41  ;;  %v7794_v47 = vmul.f32 %v7747_v43, %v8750_v19  ;;  %v404_v41 = vld [vmem:[%s9150_s2 + $0x60] sm:$0xff]  ;;  %v406_v42 = vld [vmem:[%s9150_s2 + $0x70] sm:$0xff] }
 0x2a4   :  { %v8524_v49 = vpop.eup %8523  ;;  %v6499_v50 = vpop.permute.xlu1 %6498  ;;  %v509_v43 = vld [vmem:[#allocation4] sm:$0xff] }
 0x2a5   :  { %v7875_v51 = vmul.f32 %v8524_v49, %v7794_v47  ;;  %5842 = vrot.lane.b32.xlu0 %v5795_v46, %s8566_s8  ;;  %v8526_v52 = vpop.eup %8525  ;;  %v6546_v54 = vmul.f32 %v6499_v50, %v8750_v19 }
 0x2a6   :  { %v6211_v53 = vmul.f32 %v8526_v52, %v6130_v45  ;;  %v8528_v56 = vpop.eup %8527 }
 0x2a7   :  { %7922 = vrot.lane.b32.xlu1 %v7875_v51, %s8571_s13  ;;  %v6627_v58 = vmul.f32 %v8528_v56, %v6546_v54  ;;  %v8530_v1 = vpop.eup %8529  ;;  %v3730_v51 = vmul.f32 %v8750_v19, %v8750_v19 }
 0x2a8   :  { %v7331_v38 = vpop.permute.xlu1 %7330  ;;  %v7043_v2 = vmul.f32 %v8530_v1, %v6962_v57  ;;  %v8532_v7 = vpop.eup %8531 }
 0x2a9   :  { %6258 = vrot.lane.b32.xlu0 %v6211_v53, %s8567_s9  ;;  %v7378_v3 = vmul.f32 %v7331_v38, %v8750_v19  ;;  %v8534_v52 = vpop.eup %8533 }
 0x2aa   :  { %v3747_v54 = vmul.f32 %v8534_v52, %v3730_v51  ;;  %v327_v51 = vadd.s32 64, %v8631_v9  ;;  %v512_v52 = vld [vmem:[#allocation4 + $0x18] sm:$0xff] }
 0x2ab   :  { %425 = vperm.xlu1 %8512, %v397_v55   ;;  %v7459_v8 = vmul.f32 %v8532_v7, %v7378_v3 }
 0x2ac   :  { %v3778_v56 = vsel %vm3714_vm5, %v3747_v54, 0.0  ;;  %v332_v54 = vadd.s32 104, %v8631_v9  ;;  %vm365_vm6 = vcmp.ne.s32.totalorder %v327_v51, %v8633_v10 }
 0x2ad   :  { %6674 = vrot.lane.b32.xlu0 %v6627_v58, %s8568_s10 }
 0x2af   :  { %431 = vperm.xlu1 %8512, %v399_v62  }
 0x2b1   :  { %7090 = vrot.lane.b32.xlu0 %v7043_v2, %s8569_s11 }
 0x2b3   :  { %437 = vperm.xlu1 %8512, %v401_v4  }
 0x2b5   :  { %7506 = vrot.lane.b32.xlu0 %v7459_v8, %s8570_s12 }
 0x2b7   :  { %443 = vperm.xlu1 %8512, %v403_v11  }
 0x2b9   :  { %413 = vperm.xlu0 %8511, %v393_v15  }
 0x2bb   :  { %449 = vperm.xlu1 %8512, %v405_v18  }
 0x2bd   :  { %416 = vperm.xlu0 %8511, %v394_v25  }
 0x2bf   :  { %455 = vperm.xlu1 %8512, %v407_v29   ;;  %v326_v29 = vadd.s32 56, %v8631_v9 }
 0x2c1   :  { %419 = vperm.xlu0 %8511, %v395_v32  }
 0x2c5   :  { %422 = vperm.xlu0 %8511, %v396_v33  }
 0x2c9   :  { %428 = vperm.xlu0 %8511, %v398_v34   ;;  %v323_v34 = vadd.s32 32, %v8631_v9 }
 0x2cd   :  { %434 = vperm.xlu0 %8511, %v400_v36  }
 0x2d1   :  { %440 = vperm.xlu0 %8511, %v402_v39   ;;  %v328_v39 = vadd.s32 72, %v8631_v9 }
 0x2d5   :  { %446 = vperm.xlu0 %8511, %v404_v41  }
 0x2d9   :  { %452 = vperm.xlu0 %8511, %v406_v42  }
 0x2e3   :  { %v526_v45 = vpop.xlane.xlu1 %525 }
 0x2e4   :  { %v557_v46 = vadd.f32 %v526_v45, %v509_v43  ;;  %v325_v43 = vadd.s32 48, %v8631_v9  ;;  %v511_v45 = vld [vmem:[#allocation4 + $0x10] sm:$0xff] }
 0x2e6   :  { %574 = vst.msk [vmem:[#allocation4] sm:$0xff] %vm54_vm3, %v557_v46  ;;  %v330_v46 = vadd.s32 88, %v8631_v9 }
 0x2ed   :  { %v3666_v47 = vld [vmem:[#allocation4] sm:$0xff] }
 0x2ee   :  { %vm8002_vm0 = vcmp.gt.f32.partialorder %v3666_v47, 0.0  ;;  %v8050_v3 = vmax.f32 %v3666_v47, 1.0 }
 0x2ef   :  { %v8423_v49 = vsel %vm8002_vm0, 1.0, %v8561_v37 }
 0x2f0   :  { %v8186_v50 = vsel %vm54_vm3, %v8423_v49, 0.0  ;;  %8535 = vrcp.f32 %v8050_v3 }
 0x2f1   :  { %8217 = vadd.xlane.f32.xlu1 %v8186_v50 }
 0x2fd   :  { %v8536_v16 = vpop.eup %8535 }
 0x2ff   :  { %v4179_v53 = vpop.permute.xlu0 %4178 }
 0x300   :  { %v4226_v55 = vsel %vm3970_vm4, %v4179_v53, 0.0  ;;  %vm358_vm4 = vcmp.ne.s32.totalorder %v320_v35, %v8633_v10 }
 0x301   :  { %v4242_v57 = vadd.f32 %v4226_v55, %v3778_v56  ;;  %vm377_vm5 = vmand %vm358_vm4, %vm373_vm2 }
 0x307   :  { %v4595_v58 = vpop.permute.xlu0 %4594 }
 0x308   :  { %v4642_v59 = vsel %vm4386_vm8, %v4595_v58, 0.0  ;;  %vm359_vm8 = vcmp.ne.s32.totalorder %v321_v44, %v8633_v10 }
 0x309   :  { %v4658_v60 = vadd.f32 %v4642_v59, %v4242_v57  ;;  %v329_v57 = vadd.s32 80, %v8631_v9 }
 0x30f   :  { %v5011_v61 = vpop.permute.xlu0 %5010 }
 0x310   :  { %v5058_v38 = vsel %vm4802_vm9, %v5011_v61, 0.0  ;;  %v334_v61 = vadd.s32 120, %v8631_v9 }
 0x311   :  { %v5074_v19 = vadd.f32 %v5058_v38, %v4658_v60 }
 0x313   :  { %v5427_v62 = vpop.permute.xlu0 %5426 }
 0x314   :  { %v5474_v63 = vsel %vm5218_vm10, %v5427_v62, 0.0  ;;  %vm362_vm10 = vcmp.ne.s32.totalorder %v324_v24, %v8633_v10  ;;  %v331_v62 = vadd.s32 96, %v8631_v9 }
 0x315   :  { %v5490_v22 = vadd.f32 %v5474_v63, %v5074_v19 }
 0x317   :  { %v5843_v0 = vpop.permute.xlu0 %5842 }
 0x318   :  { %v5890_v1 = vsel %vm5634_vm11, %v5843_v0, 0.0  ;;  %vm378_vm11 = vmand %vm359_vm8, %vm373_vm2  ;;  %vm361_vm8 = vcmp.ne.s32.totalorder %v323_v34, %v8633_v10  ;;  %v518_v0 = vld [vmem:[#allocation4 + $0x48] sm:$0xff] }
 0x319   :  { %v5906_v2 = vadd.f32 %v5890_v1, %v5490_v22  ;;  %v7923_v11 = vpop.permute.xlu1 %7922 }
 0x31a   :  { %v7970_v14 = vsel %vm7714_vm1, %v7923_v11, 0.0 }
 0x31b   :  { %v6259_v23 = vpop.permute.xlu0 %6258 }
 0x31c   :  { %v6306_v4 = vsel %vm6050_vm12, %v6259_v23, 0.0  ;;  %vm360_vm12 = vcmp.ne.s32.totalorder %v322_v28, %v8633_v10  ;;  %v333_v23 = vadd.s32 112, %v8631_v9 }
 0x31d   :  { %v6322_v5 = vadd.f32 %v6306_v4, %v5906_v2 }
 0x31f   :  { %v6675_v26 = vpop.permute.xlu0 %6674 }
 0x320   :  { %v6722_v6 = vsel %vm6466_vm13, %v6675_v26, 0.0 }
 0x321   :  { %v6738_v27 = vadd.f32 %v6722_v6, %v6322_v5 }
 0x323   :  { %v7091_v7 = vpop.permute.xlu0 %7090 }
 0x324   :  { %v7138_v8 = vsel %vm6882_vm14, %v7091_v7, 0.0  ;;  %vm381_vm14 = vmand %vm362_vm10, %vm373_vm2 }
 0x325   :  { %v7154_v30 = vadd.f32 %v7138_v8, %v6738_v27 }
 0x326   :  { %v426_v20 = vpop.permute.xlu1 %425 }
 0x327   :  { %v7507_v12 = vpop.permute.xlu0 %7506  ;;  %vm466_vm4 = vcmp.eq.s32.totalorder %v426_v20, %v8647_v17 }
 0x328   :  { %v7554_v13 = vsel %vm7298_vm15, %v7507_v12, 0.0  ;;  %vm364_vm15 = vcmp.ne.s32.totalorder %v326_v29, %v8633_v10  ;;  %vm482_vm10 = vmand %vm466_vm4, %vm381_vm14 }
 0x329   :  { %v7570_v31 = vadd.f32 %v7554_v13, %v7154_v30  ;;  %v498_v53 = vsel %vm482_vm10, 1.0, %v8561_v37  ;;  %v8466_v30 = vpop.f32.mrf.mxu1 }
 0x32a   :  { %v432_v48 = vpop.permute.xlu1 %431 }
 0x32b   :  { %v7986_v15 = vadd.f32 %v7970_v14, %v7570_v31  ;;  %v246_v11 = vpop.f32.mrf.mxu1 }
 0x32d   :  { %v8067_v18 = vmul.f32 %v8536_v16, %v7986_v15 }
 0x32e   :  { %v438_v36 = vpop.permute.xlu1 %437 }
 0x32f   :  { %v8098_v40 = vsel %vm8002_vm0, %v8067_v18, 0.0 }
 0x330   :  { %v8114_v21 = vsel %vm54_vm3, %v8098_v40, 0.0 }
 0x331   :  { %8145 = vadd.xlane.f32.xlu0 %v8114_v21 }
 0x332   :  { %v444_v49 = vpop.permute.xlu1 %443 }
 0x334   :  { %v414_v25 = vpop.permute.xlu0 %413 }
 0x335   :  { %vm462_vm0 = vcmp.eq.s32.totalorder %v414_v25, %v8647_v17 }
 0x336   :  { %vm478_vm9 = vmand %vm462_vm0, %vm377_vm5  ;;  %v450_v60 = vpop.permute.xlu1 %449 }
 0x337   :  { %v494_v32 = vsel %vm478_vm9, 1.0, %v8561_v37  ;;  %vm379_vm5 = vmand %vm360_vm12, %vm373_vm2 }
 0x338   :  { %v417_v33 = vpop.permute.xlu0 %416  ;;  %527 = vadd.xlane.f32.xlu0 %v494_v32  ;;  %vm9030_vm0 = vmand %vm364_vm15, %vm373_vm2  ;;  %vm363_vm15 = vcmp.ne.s32.totalorder %v325_v43, %v8633_v10 }
 0x339   :  { %vm463_vm13 = vcmp.eq.s32.totalorder %v417_v33, %v8647_v17 }
 0x33a   :  { %vm479_vm1 = vmand %vm463_vm13, %vm378_vm11  ;;  %vm366_vm11 = vcmp.ne.s32.totalorder %v328_v39, %v8633_v10  ;;  %vm468_vm13 = vcmp.eq.s32.totalorder %v432_v48, %v8647_v17  ;;  %v456_v2 = vpop.permute.xlu1 %455 }
 0x33b   :  { %v495_v41 = vsel %vm479_vm1, 1.0, %v8561_v37  ;;  %vm380_vm1 = vmand %vm361_vm8, %vm373_vm2  ;;  %vm368_vm8 = vcmp.ne.s32.totalorder %v330_v46, %v8633_v10 }
 0x33c   :  { %v420_v42 = vpop.permute.xlu0 %419  ;;  %529 = vadd.xlane.f32.xlu0 %v495_v41  ;;  %vm9045_vm14 = vmand %vm366_vm11, %vm373_vm2 }
 0x33d   :  { %vm464_vm9 = vcmp.eq.s32.totalorder %v420_v42, %v8647_v17  ;;  %v9052_v17 = vld [vmem:[%s9151_s3] ss:$0 sm:$0xff] }
 0x33e   :  { %vm480_vm12 = vmand %vm464_vm9, %vm379_vm5  ;;  %vm470_vm11 = vcmp.eq.s32.totalorder %v438_v36, %v9052_v17  ;;  %v510_v36 = vld [vmem:[#allocation4 + $0x8] sm:$0xff] }
 0x33f   :  { %v496_v47 = vsel %vm480_vm12, 1.0, %v8561_v37  ;;  %vm484_vm5 = vmand %vm468_vm13, %vm9030_vm0 }
 0x340   :  { %v423_v50 = vpop.permute.xlu0 %422  ;;  %531 = vadd.xlane.f32.xlu1 %v496_v47  ;;  %vm382_vm12 = vmand %vm363_vm15, %vm373_vm2  ;;  %v500_v59 = vsel %vm484_vm5, 1.0, %v8561_v37  ;;  %vm367_vm5 = vcmp.ne.s32.totalorder %v329_v57, %v8633_v10 }
 0x341   :  { %vm465_vm4 = vcmp.eq.s32.totalorder %v423_v50, %v9052_v17  ;;  %vm9068_vm0 = vmand %vm368_vm8, %vm373_vm2 }
 0x342   :  { %vm481_vm9 = vmand %vm465_vm4, %vm380_vm1  ;;  %vm370_vm1 = vcmp.ne.s32.totalorder %v332_v54, %v8633_v10  ;;  %vm472_vm4 = vcmp.eq.s32.totalorder %v444_v49, %v9052_v17  ;;  %v513_v54 = vld [vmem:[#allocation4 + $0x20] sm:$0xff] }
 0x343   :  { %v497_v55 = vsel %vm481_vm9, 1.0, %v8561_v37  ;;  %vm486_vm13 = vmand %vm470_vm11, %vm9045_vm14  ;;  %vm372_vm11 = vcmp.ne.s32.totalorder %v334_v61, %v8633_v10  ;;  %v516_v61 = vld [vmem:[#allocation4 + $0x38] sm:$0xff] }
 0x344   :  { %v429_v56 = vpop.permute.xlu0 %428  ;;  %533 = vadd.xlane.f32.xlu0 %v497_v55  ;;  %535 = vadd.xlane.f32.xlu1 %v498_v53  ;;  %vm384_vm8 = vmand %vm365_vm6, %vm373_vm2  ;;  %v502_v22 = vsel %vm486_vm13, 1.0, %v8561_v37  ;;  %vm369_vm13 = vcmp.ne.s32.totalorder %v331_v62, %v8633_v10  ;;  %v514_v55 = vld [vmem:[#allocation4 + $0x28] sm:$0xff] }
 0x345   :  { %vm467_vm10 = vcmp.eq.s32.totalorder %v429_v56, %v9052_v17  ;;  %vm9086_vm14 = vmand %vm370_vm1, %vm373_vm2 }
 0x346   :  { %vm483_vm15 = vmand %vm467_vm10, %vm382_vm12  ;;  %vm474_vm10 = vcmp.eq.s32.totalorder %v450_v60, %v9052_v17  ;;  %v515_v60 = vld [vmem:[#allocation4 + $0x30] sm:$0xff] }
 0x347   :  { %v499_v38 = vsel %vm483_vm15, 1.0, %v8561_v37  ;;  %vm9094_vm6 = vmand %vm472_vm4, %vm9068_vm0 }
 0x348   :  { %v435_v19 = vpop.permute.xlu0 %434  ;;  %537 = vadd.xlane.f32.xlu0 %v499_v38  ;;  %539 = vadd.xlane.f32.xlu1 %v500_v59  ;;  %vm386_vm1 = vmand %vm367_vm5, %vm373_vm2  ;;  %v504_v4 = vsel %vm9094_vm6, 1.0, %v8561_v37  ;;  %vm476_vm5 = vcmp.eq.s32.totalorder %v456_v2, %v9052_v17 }
 0x349   :  { %vm469_vm9 = vcmp.eq.s32.totalorder %v435_v19, %v9052_v17  ;;  %vm391_vm0 = vmand %vm372_vm11, %vm373_vm2  ;;  %vm371_vm11 = vcmp.ne.s32.totalorder %v333_v23, %v8633_v10 }
 0x34a   :  { %vm485_vm12 = vmand %vm469_vm9, %vm384_vm8 }
 0x34b   :  { %v501_v1 = vsel %vm485_vm12, 1.0, %v8561_v37  ;;  %vm490_vm4 = vmand %vm474_vm10, %vm9086_vm14 }
 0x34c   :  { %v441_v3 = vpop.permute.xlu0 %440  ;;  %541 = vadd.xlane.f32.xlu0 %v501_v1  ;;  %543 = vadd.xlane.f32.xlu1 %v502_v22  ;;  %vm388_vm9 = vmand %vm369_vm13, %vm373_vm2  ;;  %v506_v26 = vsel %vm490_vm4, 1.0, %v8561_v37  ;;  %v517_v22 = vld [vmem:[#allocation4 + $0x40] sm:$0xff] }
 0x34d   :  { %vm471_vm15 = vcmp.eq.s32.totalorder %v441_v3, %v9052_v17  ;;  %vm492_vm14 = vmand %vm476_vm5, %vm391_vm0 }
 0x34e   :  { %vm487_vm8 = vmand %vm471_vm15, %vm386_vm1  ;;  %v508_v7 = vsel %vm492_vm14, 1.0, %v8561_v37 }
 0x34f   :  { %v503_v9 = vsel %vm487_vm8, 1.0, %v8561_v37  ;;  %vm390_vm6 = vmand %vm371_vm11, %vm373_vm2  ;;  %vm9166_vm2 = vcmp.eq.s32.totalorder %v8633_v10, 1 }
 0x350   :  { %v447_v5 = vpop.permute.xlu0 %446  ;;  %545 = vadd.xlane.f32.xlu0 %v503_v9  ;;  %547 = vadd.xlane.f32.xlu1 %v504_v4  ;;  %v8469_v13 = vpop.f32.mrf.mxu1  ;;  %v519_v4 = vld [vmem:[#allocation4 + $0x50] sm:$0xff]  ;;  %v520_v9 = vld [vmem:[#allocation4 + $0x58] sm:$0xff] }
 0x351   :  { %vm473_vm12 = vcmp.eq.s32.totalorder %v447_v5, %v9052_v17 }
 0x352   :  { %vm489_vm10 = vmand %vm473_vm12, %vm388_vm9  ;;  %v256_v14 = vpop.f32.mrf.mxu1 }
 0x353   :  { %v505_v6 = vsel %vm489_vm10, 1.0, %v8561_v37  ;;  %v524_v14 = vld [vmem:[#allocation4 + $0x78] sm:$0xff] }
 0x354   :  { %v453_v27 = vpop.permute.xlu0 %452  ;;  %549 = vadd.xlane.f32.xlu0 %v505_v6  ;;  %551 = vadd.xlane.f32.xlu1 %v506_v26 }
 0x355   :  { %vm475_vm1 = vcmp.eq.s32.totalorder %v453_v27, %v9052_v17 }
 0x356   :  { %vm491_vm13 = vmand %vm475_vm1, %vm390_vm6 }
 0x357   :  { %v507_v8 = vsel %vm491_vm13, 1.0, %v8561_v37  ;;  %v8472_v16 = vpop.f32.mrf.mxu1 }
 0x358   :  { %553 = vadd.xlane.f32.xlu0 %v507_v8  ;;  %555 = vadd.xlane.f32.xlu1 %v508_v7  ;;  %v521_v7 = vld [vmem:[#allocation4 + $0x60] sm:$0xff]  ;;  %v522_v8 = vld [vmem:[#allocation4 + $0x68] sm:$0xff] }
 0x359   :  { %v266_v18 = vpop.f32.mrf.mxu1 }
 0x35a   :  { %v8457_v12 = vpop.f32.mrf.mxu0 }
 0x35c   :  { %v216_v31 = vpop.f32.mrf.mxu0 }
 0x35d   :  { %v523_v31 = vld [vmem:[#allocation4 + $0x70] sm:$0xff] }
 0x35e   :  { %v8460_v15 = vpop.f32.mrf.mxu0  ;;  %v8475_v40 = vpop.f32.mrf.mxu1 }
 0x360   :  { %v226_v35 = vpop.f32.mrf.mxu0  ;;  %v276_v44 = vpop.f32.mrf.mxu1 }
 0x362   :  { %v8463_v20 = vpop.f32.mrf.mxu0 }
 0x364   :  { %v236_v21 = vpop.f32.mrf.mxu0 }
 0x37a   :  { %v8218_v24 = vpop.xlane.xlu1 %8217 }
 0x37b   :  { %v8219_v48 = vrot.slane %v8218_v24, 4 }
 0x37d   :  { %v8220_v25 = vadd.f32 %v8219_v48, %v8218_v24 }
 0x37f   :  { %v8221_v37 = vrot.slane %v8220_v25, 2 }
 0x381   :  { %v8222_v33 = vadd.f32 %v8221_v37, %v8220_v25 }
 0x383   :  { %v8223_v43 = vrot.slane %v8222_v33, 1 }
 0x385   :  { %v8224_v51 = vadd.f32 %v8223_v43, %v8222_v33 }
 0x3ba   :  { %v8146_v28 = vpop.xlane.xlu0 %8145 }
 0x3bb   :  { %v8147_v29 = vrot.slane %v8146_v28, 4 }
 0x3bd   :  { %v8148_v32 = vadd.f32 %v8147_v29, %v8146_v28 }
 0x3bf   :  { %v8149_v34 = vrot.slane %v8148_v32, 2 }
 0x3c1   :  { %v528_v39 = vpop.xlane.xlu0 %527  ;;  %v8150_v41 = vadd.f32 %v8149_v34, %v8148_v32 }
 0x3c2   :  { %v558_v42 = vadd.f32 %v528_v39, %v510_v36 }
 0x3c3   :  { %v8151_v46 = vrot.slane %v8150_v41, 1 }
 0x3c4   :  { %575 = vst.msk [vmem:[#allocation4 + $0x8] sm:$0xff] %vm54_vm3, %v558_v42 }
 0x3c5   :  { %v530_v47 = vpop.xlane.xlu0 %529  ;;  %v8152_v49 = vadd.f32 %v8151_v46, %v8150_v41 }
 0x3c6   :  { %v559_v50 = vadd.f32 %v530_v47, %v511_v45 }
 0x3c7   :  { %8484 = vpush %v8152_v49 }
 0x3c8   :  { %576 = vst.msk [vmem:[#allocation4 + $0x10] sm:$0xff] %vm54_vm3, %v559_v50 }
 0x3c9   :  { %8486 = vpush %v8224_v51  ;;  %v532_v17 = vpop.xlane.xlu1 %531 }
 0x3ca   :  { %v560_v53 = vadd.f32 %v532_v17, %v512_v52 }
 0x3cc   :  { %577 = vst.msk [vmem:[#allocation4 + $0x18] sm:$0xff] %vm54_vm3, %v560_v53 }
 0x3cd   :  { %v534_v56 = vpop.xlane.xlu0 %533  ;;  %v536_v57 = vpop.xlane.xlu1 %535 }
 0x3ce   :  { %v561_v58 = vadd.f32 %v534_v56, %v513_v54  ;;  %v562_v59 = vadd.f32 %v536_v57, %v514_v55 }
 0x3d0   :  { %578 = vst.msk [vmem:[#allocation4 + $0x20] sm:$0xff] %vm54_vm3, %v561_v58  ;;  %579 = vst.msk [vmem:[#allocation4 + $0x28] sm:$0xff] %vm54_vm3, %v562_v59 }
 0x3d1   :  { %v538_v38 = vpop.xlane.xlu0 %537  ;;  %v540_v19 = vpop.xlane.xlu1 %539 }
 0x3d2   :  { %v563_v62 = vadd.f32 %v538_v38, %v515_v60  ;;  %v564_v63 = vadd.f32 %v540_v19, %v516_v61 }
 0x3d4   :  { %580 = vst.msk [vmem:[#allocation4 + $0x30] sm:$0xff] %vm54_vm3, %v563_v62  ;;  %581 = vst.msk [vmem:[#allocation4 + $0x38] sm:$0xff] %vm54_vm3, %v564_v63 }
 0x3d5   :  { %v542_v1 = vpop.xlane.xlu0 %541  ;;  %v544_v2 = vpop.xlane.xlu1 %543 }
 0x3d6   :  { %v565_v3 = vadd.f32 %v542_v1, %v517_v22  ;;  %v566_v23 = vadd.f32 %v544_v2, %v518_v0 }
 0x3d8   :  { %582 = vst.msk [vmem:[#allocation4 + $0x40] sm:$0xff] %vm54_vm3, %v565_v3  ;;  %583 = vst.msk [vmem:[#allocation4 + $0x48] sm:$0xff] %vm54_vm3, %v566_v23 }
 0x3d9   :  { %v546_v5 = vpop.xlane.xlu0 %545  ;;  %v548_v26 = vpop.xlane.xlu1 %547 }
 0x3da   :  { %v567_v6 = vadd.f32 %v546_v5, %v519_v4  ;;  %v568_v27 = vadd.f32 %v548_v26, %v520_v9 }
 0x3dc   :  { %584 = vst.msk [vmem:[#allocation4 + $0x50] sm:$0xff] %vm54_vm3, %v567_v6  ;;  %585 = vst.msk [vmem:[#allocation4 + $0x58] sm:$0xff] %vm54_vm3, %v568_v27 }
 0x3dd   :  { %v550_v30 = vpop.xlane.xlu0 %549  ;;  %v552_v11 = vpop.xlane.xlu1 %551 }
 0x3de   :  { %v569_v12 = vadd.f32 %v550_v30, %v521_v7  ;;  %v570_v13 = vadd.f32 %v552_v11, %v522_v8 }
 0x3e0   :  { %586 = vst.msk [vmem:[#allocation4 + $0x60] sm:$0xff] %vm54_vm3, %v569_v12  ;;  %587 = vst.msk [vmem:[#allocation4 + $0x68] sm:$0xff] %vm54_vm3, %v570_v13 }
 0x3e1   :  { %v554_v15 = vpop.xlane.xlu0 %553  ;;  %v556_v16 = vpop.xlane.xlu1 %555 }
 0x3e2   :  { %v571_v35 = vadd.f32 %v554_v15, %v523_v31  ;;  %v572_v18 = vadd.f32 %v556_v16, %v524_v14 }
 0x3e4   :  { %588 = vst.msk [vmem:[#allocation4 + $0x70] sm:$0xff] %vm54_vm3, %v571_v35  ;;  %589 = vst.msk [vmem:[#allocation4 + $0x78] sm:$0xff] %vm54_vm3, %v572_v18 }
 0x3f8   :  { %s8485_s3 = spop %8484 }
 0x3f9   :  { %v8226_v20 = vstv %s8485_s3 }
 0x3fa   :  { %s8487_s28 = spop %8486  ;;  %v8227_v40 = vsel %vm750_vm7, %v8226_v20, 0.0 }
 0x3fb   :  { %v8228_v21 = vstv %s8487_s28 }
 0x3fc   :  { %v8229_v44 = vsel %vm9166_vm2, %v8228_v21, 0.0 }
 0x3fd   :  { %v8230_v24 = vadd.f32 %v8229_v44, %v8227_v40 }
 0x3ff   :  { %8231 = vst [vmem:[#allocation5] sm:$0x1] %v8230_v24 }
 0x400   :  { %8549 = shalt.err (!%p8546_p4)
}
 0x401   :  { %8241 = dma.vmem_to_hbm [thread:$0]  %s8239_s29, 16, %s9152_s4, [#allocation6]  }
 0x402   :  { %8558 = dma.done.wait [#allocation6], 16  }
 0x403   :  { %8559 = vsyncadd [#allocation6], 4294967280 }
 0x404   :  { %8245 = vsyncpa [#allocation6], 1 }

</bundles_post_ra>
